<compile_context>
chip_gen: v6e
topology: v6e:2x2x1
jax: 0.10.0
libtpu: 0.0.40
codegen_flags: <defaults>
</compile_context>

<pallas_src>
import functools

import jax
import jax.numpy as jnp
from jax.experimental import pallas as pl
from jax.experimental.pallas import tpu as pltpu

BN_EPS = 1e-5
# ResNet-34 stages: (out_channels, num_blocks, first_stride)
LAYER_SPECS = ((64, 3, 1), (128, 4, 2), (256, 6, 2), (512, 3, 2))


def _round_up(x, m):
    return ((x + m - 1) // m) * m


# ---------------- kernel 1: fused stride-1 3x3 conv (in-kernel im2col) -------
# The padded input map of one image is a flat (rows, C) slab resident in VMEM.
# Output position r = oh*Wp + ow (columns ow >= Wo are garbage, sliced off in
# the wrapper) accumulates, for tap t=(i,j), x_flat[r + i*Wp + j] @ W_t.
# Every tap is therefore a *contiguous* row-offset slice -> one MXU dot each,
# f32 accumulator, folded-BN shift + optional residual + ReLU in the epilogue.
def _conv_tap_body(x_ref, w_ref, b_ref, r_ref, o_ref, *, k, wp, relu,
                   single_row_tile):
    tm, tn = o_ref.shape
    c = x_ref.shape[-1]
    row0 = 0 if single_row_tile else pl.program_id(2) * tm
    acc = jnp.zeros((tm, tn), jnp.float32)
    for t in range(k * k):                      # unrolled: k*k MXU dots
        off = (t // k) * wp + (t % k)
        xa = x_ref[pl.ds(row0 + off, tm), :]
        acc = acc + jnp.dot(xa, w_ref[t * c:(t + 1) * c, :],
                            preferred_element_type=jnp.float32)
    acc = acc + b_ref[...]
    if r_ref is not None:
        acc = acc + r_ref[...].astype(jnp.float32)
    if relu:
        acc = jnp.maximum(acc, 0.0)
    o_ref[...] = acc.astype(o_ref.dtype)


def _conv_tap_kernel(x_ref, w_ref, b_ref, o_ref, **kw):
    _conv_tap_body(x_ref, w_ref, b_ref, None, o_ref, **kw)


def _conv_tap_res_kernel(x_ref, w_ref, b_ref, r_ref, o_ref, **kw):
    _conv_tap_body(x_ref, w_ref, b_ref, r_ref, o_ref, **kw)


def _conv_s1_fused(x, p, *, k, padding, relu, residual):
    """Stride-1 kxk conv + folded BN (+ residual) (+ ReLU).  x: (B,H,W,C) bf16/f32."""
    B, H, W, C = x.shape
    N = p["w"].shape[1]
    Hp, Wp = H + 2 * padding, W + 2 * padding
    Ho, Wo = Hp - k + 1, Wp - k + 1
    R = Ho * Wp                                   # computed rows (Wp-Wo garbage cols/row)

    if R <= 1024:                                 # one row tile (all test shapes)
        TMR, n_im = R, 1
    else:                                         # larger images: tile rows
        TMR = 512
        n_im = pl.cdiv(R, TMR)
    R_pad = TMR * n_im
    TN = N if N <= 128 else 128                   # output-channel tiling (grid axis)
    n_jn = N // TN

    XR = R_pad + (k - 1) * (Wp + 1)               # flat-slab rows so all tap reads are in-bounds
    xb = jnp.pad(x.astype(jnp.bfloat16),
                 ((0, 0), (padding, padding), (padding, padding), (0, 0)))
    xflat = xb.reshape(B, Hp * Wp, C)
    xflat = jnp.pad(xflat, ((0, 0), (0, XR - Hp * Wp), (0, 0)))

    x_spec = pl.BlockSpec((None, XR, C), lambda b, j, i: (b, 0, 0))   # VMEM-resident per image
    w_spec = pl.BlockSpec((k * k * C, TN), lambda b, j, i: (0, j))    # streamed per cout tile
    b_spec = pl.BlockSpec((1, TN), lambda b, j, i: (0, j))
    o_spec = pl.BlockSpec((None, TMR, TN), lambda b, j, i: (b, i, j))

    args = [xflat, p["w"], p["shift"]]
    in_specs = [x_spec, w_spec, b_spec]
    kw = dict(k=k, wp=Wp, relu=relu, single_row_tile=(n_im == 1))
    if residual is not None:
        res = jnp.pad(residual.astype(jnp.bfloat16),
                      ((0, 0), (0, 0), (0, Wp - Wo), (0, 0))).reshape(B, Ho * Wp, N)
        res = jnp.pad(res, ((0, 0), (0, R_pad - R), (0, 0)))
        args.append(res)
        in_specs.append(o_spec)
        kernel = functools.partial(_conv_tap_res_kernel, **kw)
    else:
        kernel = functools.partial(_conv_tap_kernel, **kw)

    cost = pl.CostEstimate(
        flops=2 * B * R_pad * k * k * C * N, transcendentals=0,
        bytes_accessed=(B * XR * C * 2 + k * k * C * N * 2 + 4 * N
                        + (2 if residual is not None else 1) * B * R_pad * N * 2))

    out = pl.pallas_call(
        kernel,
        out_shape=jax.ShapeDtypeStruct((B, R_pad, N), jnp.bfloat16),
        grid=(B, n_jn, n_im),
        in_specs=in_specs,
        out_specs=o_spec,
        compiler_params=pltpu.CompilerParams(
            dimension_semantics=("parallel", "parallel", "parallel")),
        cost_estimate=cost,
    )(*args)
    return out[:, :R, :].reshape(B, Ho, Wp, N)[:, :, :Wo, :]


# ---------------- kernel 2: matmul path for the stride-2 convs ---------------
def _mm_bn_act_kernel(x_ref, w_ref, b_ref, o_ref, *, relu):
    acc = jnp.dot(x_ref[...], w_ref[...], preferred_element_type=jnp.float32)
    acc = acc + b_ref[...]
    if relu:
        acc = jnp.maximum(acc, 0.0)
    o_ref[...] = acc.astype(o_ref.dtype)


def _matmul_bn_act(xmat, w, shift, relu=True):
    """(M, K) @ (K, N) + folded-BN shift (+ ReLU); tiled over rows and channels."""
    xmat = xmat.astype(jnp.bfloat16)
    M, K = xmat.shape
    N = w.shape[1]
    TM = 256 if M >= 256 else _round_up(M, 8)
    Mp = _round_up(M, TM)
    if Mp != M:
        xmat = jnp.pad(xmat, ((0, Mp - M), (0, 0)))
    TN = N if N <= 128 else 128
    grid = (Mp // TM, N // TN)

    cost = pl.CostEstimate(flops=2 * Mp * K * N, transcendentals=0,
                           bytes_accessed=Mp * K * 2 + K * N * 2 + 4 * N + Mp * N * 2)
    out = pl.pallas_call(
        functools.partial(_mm_bn_act_kernel, relu=relu),
        out_shape=jax.ShapeDtypeStruct((Mp, N), jnp.bfloat16),
        grid=grid,
        in_specs=[pl.BlockSpec((TM, K), lambda i, j: (i, 0)),
                  pl.BlockSpec((K, TN), lambda i, j: (0, j)),
                  pl.BlockSpec((1, TN), lambda i, j: (0, j))],
        out_specs=pl.BlockSpec((TM, TN), lambda i, j: (i, j)),
        compiler_params=pltpu.CompilerParams(
            dimension_semantics=("parallel", "parallel")),
        cost_estimate=cost,
    )(xmat, w, shift)
    return out[:M]


def _im2col(x, k, stride, padding):
    """x: (B, H, W, C) NHWC -> ((B*Ho*Wo, k*k*C) bf16, Ho, Wo).  Only used for
    stride-2 convs (k=1 has no duplication; k=3/7 stride-2 write 4x-smaller maps)."""
    B, H, W, C = x.shape
    if padding:
        x = jnp.pad(x, ((0, 0), (padding, padding), (padding, padding), (0, 0)))
    Ho = (H + 2 * padding - k) // stride + 1
    Wo = (W + 2 * padding - k) // stride + 1
    cols = []
    for i in range(k):
        for j in range(k):
            cols.append(x[:, i:i + stride * (Ho - 1) + 1:stride,
                          j:j + stride * (Wo - 1) + 1:stride, :])
    patches = jnp.stack(cols, axis=3)                    # (B, Ho, Wo, k*k, C)
    patches = patches.reshape(B * Ho * Wo, k * k * C)    # K ordering = (kh, kw, C)
    return patches.astype(jnp.bfloat16), Ho, Wo


# ------------------------------ conv dispatcher -------------------------------
def conv_bn_act(x, p, *, k, stride, padding, relu=True, residual=None):
    """Fused conv + eval-mode BN (+ residual) (+ ReLU). x: (B,H,W,Cin) NHWC."""
    if stride == 1 and k > 1:
        return _conv_s1_fused(x, p, k=k, padding=padding, relu=relu,
                              residual=residual)
    assert residual is None                              # residuals only on conv2 (stride 1)
    B = x.shape[0]
    patches, Ho, Wo = _im2col(x, k, stride, padding)
    out = _matmul_bn_act(patches, p["w"], p["shift"], relu=relu)
    return out.reshape(B, Ho, Wo, -1)


def maxpool_3x3_s2(x):
    # TODO(synk): pooling is a cheap elementwise max; left to XLA (VPU).
    B, H, W, C = x.shape
    pad_val = jnp.finfo(x.dtype).min
    xp = jnp.pad(x, ((0, 0), (1, 1), (1, 1), (0, 0)), constant_values=pad_val)
    Ho = (H + 2 - 3) // 2 + 1
    Wo = (W + 2 - 3) // 2 + 1
    out = None
    for i in range(3):
        for j in range(3):
            sl = xp[:, i:i + 2 * (Ho - 1) + 1:2, j:j + 2 * (Wo - 1) + 1:2, :]
            out = sl if out is None else jnp.maximum(out, sl)
    return out


def normalize_imagenet(x):
    """x: (B, 3, H, W) NCHW, matches the PyTorch reference.
    TODO(synk): folding this affine into conv1 is only exact away from the
    zero-padded border (padding applies to the *normalized* image), so it is
    kept as one tiny elementwise pass."""
    mean = jnp.array([0.485, 0.456, 0.406], x.dtype).reshape(1, 3, 1, 1)
    std = jnp.array([0.229, 0.224, 0.225], x.dtype).reshape(1, 3, 1, 1)
    return (x - mean) / std


# ------------------------------ parameters -----------------------------------
def _conv_bn_params(key, c_in, c_out, k, gamma_scale=1.0):
    # TODO(synk): torchvision's pretrained ResNet-34 weights are not available
    # offline; He-init conv weights + synthetic eval-mode BN running stats
    # stand in (same math, different numbers).
    kw, kg, kb, km = jax.random.split(key, 4)
    K = k * k * c_in
    # Weight layout (K, C_out), K ordered (kh, kw, C_in) == permuted PyTorch
    # (C_out, C_in, kh, kw).  Eval-mode BN scale is folded into the columns.
    w = jax.random.normal(kw, (K, c_out), jnp.float32) * jnp.sqrt(2.0 / K)
    gamma = gamma_scale * (1.0 + 0.05 * jax.random.normal(kg, (c_out,), jnp.float32))
    beta = 0.05 * jax.random.normal(kb, (c_out,), jnp.float32)
    r_mean = 0.1 * jax.random.normal(km, (c_out,), jnp.float32)
    r_var = jnp.ones((c_out,), jnp.float32)
    s = gamma / jnp.sqrt(r_var + BN_EPS)
    return {
        "w": (w * s[None, :]).astype(jnp.bfloat16),      # BN scale folded, bf16 storage
        "shift": (beta - r_mean * s).reshape(1, c_out),  # f32 per-channel shift
    }


def _block_configs():
    cfgs = []
    c_in = 64
    for c_out, n_blocks, stride in LAYER_SPECS:
        for b in range(n_blocks):
            cfgs.append((c_in, c_out, stride if b == 0 else 1))
            c_in = c_out
    return tuple(cfgs)


BLOCK_CFGS = _block_configs()


def init_image_cnn_params(key):
    keys = iter(jax.random.split(key, 2 + 3 * len(BLOCK_CFGS)))
    params = {"conv1": _conv_bn_params(next(keys), 3, 64, 7), "blocks": []}
    for c_in, c_out, s in BLOCK_CFGS:
        blk = {
            "conv1": _conv_bn_params(next(keys), c_in, c_out, 3),
            # Small gamma on the block-final BN keeps the synthetic network's
            # activations well conditioned through 16 residual adds (real
            # pretrained running stats would be loaded here instead).
            "conv2": _conv_bn_params(next(keys), c_out, c_out, 3, gamma_scale=0.4),
        }
        if s != 1 or c_in != c_out:                      # 1x1 downsample branch
            blk["down"] = _conv_bn_params(next(keys), c_in, c_out, 1, gamma_scale=0.4)
        params["blocks"].append(blk)
    return params


# -------------------------------- forward ------------------------------------
def _basic_block(x, blk, stride):
    identity = x
    h = conv_bn_act(x, blk["conv1"], k=3, stride=stride, padding=1, relu=True)
    if "down" in blk:
        identity = conv_bn_act(x, blk["down"], k=1, stride=stride, padding=0,
                               relu=False)
    # relu(bn2(conv2(h)) + identity) — residual + ReLU fused in the kernel.
    return conv_bn_act(h, blk["conv2"], k=3, stride=1, padding=1, relu=True,
                       residual=identity)


@jax.jit
def image_cnn_forward(image, params):
    """image: (B, 3, H, W) NCHW float32 -> (B, 512) float32."""
    x = normalize_imagenet(image)
    x = jnp.transpose(x, (0, 2, 3, 1))                   # NCHW -> NHWC (lane-dense C)
    x = conv_bn_act(x, params["conv1"], k=7, stride=2, padding=3, relu=True)
    x = maxpool_3x3_s2(x)
    for (_, _, stride), blk in zip(BLOCK_CFGS, params["blocks"]):
        x = _basic_block(x, blk, stride)
    return jnp.mean(x.astype(jnp.float32), axis=(1, 2))  # avg pool; fc == nn.Sequential()


# --------------------- pure-JAX reference (correctness) ----------------------
def _ref_conv_bn_act(x, p, *, k, stride, padding, relu=True, residual=None):
    c_in = x.shape[-1]
    kern = p["w"].reshape(k, k, c_in, -1)                # HWIO, same K ordering
    y = jax.lax.conv_general_dilated(
        x.astype(jnp.bfloat16), kern, (stride, stride),
        [(padding, padding), (padding, padding)],
        dimension_numbers=("NHWC", "HWIO", "NHWC"),
        preferred_element_type=jnp.float32)
    y = y + p["shift"]
    if residual is not None:
        y = y + residual.astype(jnp.float32)
    if relu:
        y = jnp.maximum(y, 0.0)
    return y.astype(jnp.bfloat16)                        # matched bf16 layer boundary


def _ref_forward(image, params):
    x = normalize_imagenet(image)
    x = jnp.transpose(x, (0, 2, 3, 1))
    x = _ref_conv_bn_act(x, params["conv1"], k=7, stride=2, padding=3)
    x = maxpool_3x3_s2(x)
    for (_, _, stride), blk in zip(BLOCK_CFGS, params["blocks"]):
        identity = x
        h = _ref_conv_bn_act(x, blk["conv1"], k=3, stride=stride, padding=1)
        if "down" in blk:
            identity = _ref_conv_bn_act(x, blk["down"], k=1, stride=stride,
                                        padding=0, relu=False)
        x = _ref_conv_bn_act(h, blk["conv2"], k=3, stride=1, padding=1,
                             residual=identity)
    return jnp.mean(x.astype(jnp.float32), axis=(1, 2))


if __name__ == "__main__":
    key = jax.random.PRNGKey(0)
    k_img, k_par, k1, k2 = jax.random.split(key, 4)

    # --- unit test 1: fused stride-1 3x3 conv (in-kernel im2col, residual) ---
    B, H, W, C, N = 2, 16, 16, 64, 64
    xt = jax.random.normal(k1, (B, H, W, C), jnp.float32)
    pt = _conv_bn_params(jax.random.fold_in(k1, 1), C, N, 3)
    rt = jax.random.normal(jax.random.fold_in(k1, 2), (B, H, W, N),
                           jnp.float32).astype(jnp.bfloat16)
    got = jax.block_until_ready(
        conv_bn_act(xt, pt, k=3, stride=1, padding=1, relu=True, residual=rt))
    ref = _ref_conv_bn_act(xt, pt, k=3, stride=1, padding=1, relu=True, residual=rt)
    assert jnp.allclose(got.astype(jnp.float32), ref.astype(jnp.float32),
                        atol=2e-2, rtol=2e-2), \
        float(jnp.max(jnp.abs(got.astype(jnp.float32) - ref.astype(jnp.float32))))

    # --- unit test 2: im2col/matmul path (7x7 stride-2 conv, M/N tiling) -----
    xt2 = jnp.transpose(jax.random.normal(k2, (2, 3, 32, 32), jnp.float32),
                        (0, 2, 3, 1))
    pt2 = _conv_bn_params(jax.random.fold_in(k2, 1), 3, 64, 7)
    got2 = jax.block_until_ready(
        conv_bn_act(xt2, pt2, k=7, stride=2, padding=3, relu=True))
    ref2 = _ref_conv_bn_act(xt2, pt2, k=7, stride=2, padding=3, relu=True)
    assert jnp.allclose(got2.astype(jnp.float32), ref2.astype(jnp.float32),
                        atol=2e-2, rtol=2e-2)

    # --- full ImageCNN (ResNet-34 backbone, fc removed) forward ---------------
    Bi, Hi, Wi = 2, 64, 64
    image = jax.random.uniform(k_img, (Bi, 3, Hi, Wi), jnp.float32)  # NCHW RGB in [0,1]
    params = init_image_cnn_params(k_par)

    out = jax.block_until_ready(image_cnn_forward(image, params))
    assert out.shape == (Bi, 512), out.shape
    assert bool(jnp.all(jnp.isfinite(out)))

    # End-to-end check vs a pure-JAX lax.conv pipeline of the same math.  Both
    # pipelines round activations to bf16 at every layer boundary; the residual
    # 33-layer / 16-residual-add drift is compounded bf16 noise, so the tight
    # correctness burden is carried by the single-layer unit tests above and
    # this check guards the architecture wiring with scale-aware tolerances.
    ref_out = _ref_forward(image, params)
    err = float(jnp.max(jnp.abs(out - ref_out)))
    scale = float(jnp.max(jnp.abs(ref_out)))
    assert err <= 0.1 * max(scale, 1.0), (err, scale)
    cos = jnp.sum(out * ref_out, axis=-1) / (
        jnp.linalg.norm(out, axis=-1) * jnp.linalg.norm(ref_out, axis=-1) + 1e-6)
    assert float(jnp.min(cos)) > 0.99, float(jnp.min(cos))

    print("KERNEL_OK")
</pallas_src>

<mosaic_0001>
module attributes {stable_mosaic.version = 11 : i64} {
  func.func @_conv_tap_res_kernel(%arg0: i32, %arg1: i32, %arg2: i32, %arg3: memref<1x326x64xbf16, #tpu.memory_space<vmem>>, %arg4: memref<576x64xbf16, #tpu.memory_space<vmem>>, %arg5: memref<1x64xf32, #tpu.memory_space<vmem>>, %arg6: memref<1x288x64xbf16, #tpu.memory_space<vmem>>, %arg7: memref<1x288x64xbf16, #tpu.memory_space<vmem>>) attributes {dimension_semantics = [#tpu.dimension_semantics<parallel>, #tpu.dimension_semantics<parallel>, #tpu.dimension_semantics<parallel>], iteration_bounds = array<i64: 2, 1, 1>, scalar_prefetch = 0 : i64, scratch_operands = 0 : i64, tpu.core_type = #tpu.core_type<tc>, window_params = [{transform_indices = @transform_0, window_bounds = array<i64: 1, 326, 64>}, {transform_indices = @transform_1, window_bounds = array<i64: 576, 64>}, {transform_indices = @transform_2, window_bounds = array<i64: 1, 64>}, {transform_indices = @transform_3, window_bounds = array<i64: 1, 288, 64>}, {transform_indices = @transform_4, window_bounds = array<i64: 1, 288, 64>}]} {
    %cst = arith.constant 0.000000e+00 : f32
    %0 = vector.broadcast %cst : f32 to vector<288x64xf32>
    %c0 = arith.constant 0 : index
    %c0_0 = arith.constant 0 : index
    %c0_1 = arith.constant 0 : index
    %1 = vector.load %arg3[%c0, %c0_0, %c0_1] : memref<1x326x64xbf16, #tpu.memory_space<vmem>>, vector<1x288x64xbf16>
    %2 = vector.shape_cast %1 : vector<1x288x64xbf16> to vector<288x64xbf16>
    %c0_2 = arith.constant 0 : index
    %c0_3 = arith.constant 0 : index
    %3 = vector.load %arg4[%c0_2, %c0_3] : memref<576x64xbf16, #tpu.memory_space<vmem>>, vector<64x64xbf16>
    %cst_4 = arith.constant dense<0.000000e+00> : vector<288x64xf32>
    %4 = tpu.matmul %2, %3, %cst_4 {dimension_numbers = #tpu.dot_dimension_numbers<[1], [0], [0], [1], [0, 0, 1, 1], [], []>} : vector<288x64xbf16>, vector<64x64xbf16>, vector<288x64xf32> -> vector<288x64xf32>
    %5 = arith.addf %0, %4 : vector<288x64xf32>
    %c0_5 = arith.constant 0 : index
    %c1 = arith.constant 1 : index
    %c0_6 = arith.constant 0 : index
    %6 = vector.load %arg3[%c0_5, %c1, %c0_6] : memref<1x326x64xbf16, #tpu.memory_space<vmem>>, vector<1x288x64xbf16>
    %7 = vector.shape_cast %6 : vector<1x288x64xbf16> to vector<288x64xbf16>
    %c64 = arith.constant 64 : index
    %c0_7 = arith.constant 0 : index
    %8 = vector.load %arg4[%c64, %c0_7] : memref<576x64xbf16, #tpu.memory_space<vmem>>, vector<64x64xbf16>
    %cst_8 = arith.constant dense<0.000000e+00> : vector<288x64xf32>
    %9 = tpu.matmul %7, %8, %cst_8 {dimension_numbers = #tpu.dot_dimension_numbers<[1], [0], [0], [1], [0, 0, 1, 1], [], []>} : vector<288x64xbf16>, vector<64x64xbf16>, vector<288x64xf32> -> vector<288x64xf32>
    %10 = arith.addf %5, %9 : vector<288x64xf32>
    %c0_9 = arith.constant 0 : index
    %c2 = arith.constant 2 : index
    %c0_10 = arith.constant 0 : index
    %11 = vector.load %arg3[%c0_9, %c2, %c0_10] : memref<1x326x64xbf16, #tpu.memory_space<vmem>>, vector<1x288x64xbf16>
    %12 = vector.shape_cast %11 : vector<1x288x64xbf16> to vector<288x64xbf16>
    %c128 = arith.constant 128 : index
    %c0_11 = arith.constant 0 : index
    %13 = vector.load %arg4[%c128, %c0_11] : memref<576x64xbf16, #tpu.memory_space<vmem>>, vector<64x64xbf16>
    %cst_12 = arith.constant dense<0.000000e+00> : vector<288x64xf32>
    %14 = tpu.matmul %12, %13, %cst_12 {dimension_numbers = #tpu.dot_dimension_numbers<[1], [0], [0], [1], [0, 0, 1, 1], [], []>} : vector<288x64xbf16>, vector<64x64xbf16>, vector<288x64xf32> -> vector<288x64xf32>
    %15 = arith.addf %10, %14 : vector<288x64xf32>
    %c0_13 = arith.constant 0 : index
    %c18 = arith.constant 18 : index
    %c0_14 = arith.constant 0 : index
    %16 = vector.load %arg3[%c0_13, %c18, %c0_14] : memref<1x326x64xbf16, #tpu.memory_space<vmem>>, vector<1x288x64xbf16>
    %17 = vector.shape_cast %16 : vector<1x288x64xbf16> to vector<288x64xbf16>
    %c192 = arith.constant 192 : index
    %c0_15 = arith.constant 0 : index
    %18 = vector.load %arg4[%c192, %c0_15] : memref<576x64xbf16, #tpu.memory_space<vmem>>, vector<64x64xbf16>
    %cst_16 = arith.constant dense<0.000000e+00> : vector<288x64xf32>
    %19 = tpu.matmul %17, %18, %cst_16 {dimension_numbers = #tpu.dot_dimension_numbers<[1], [0], [0], [1], [0, 0, 1, 1], [], []>} : vector<288x64xbf16>, vector<64x64xbf16>, vector<288x64xf32> -> vector<288x64xf32>
    %20 = arith.addf %15, %19 : vector<288x64xf32>
    %c0_17 = arith.constant 0 : index
    %c19 = arith.constant 19 : index
    %c0_18 = arith.constant 0 : index
    %21 = vector.load %arg3[%c0_17, %c19, %c0_18] : memref<1x326x64xbf16, #tpu.memory_space<vmem>>, vector<1x288x64xbf16>
    %22 = vector.shape_cast %21 : vector<1x288x64xbf16> to vector<288x64xbf16>
    %c256 = arith.constant 256 : index
    %c0_19 = arith.constant 0 : index
    %23 = vector.load %arg4[%c256, %c0_19] : memref<576x64xbf16, #tpu.memory_space<vmem>>, vector<64x64xbf16>
    %cst_20 = arith.constant dense<0.000000e+00> : vector<288x64xf32>
    %24 = tpu.matmul %22, %23, %cst_20 {dimension_numbers = #tpu.dot_dimension_numbers<[1], [0], [0], [1], [0, 0, 1, 1], [], []>} : vector<288x64xbf16>, vector<64x64xbf16>, vector<288x64xf32> -> vector<288x64xf32>
    %25 = arith.addf %20, %24 : vector<288x64xf32>
    %c0_21 = arith.constant 0 : index
    %c20 = arith.constant 20 : index
    %c0_22 = arith.constant 0 : index
    %26 = vector.load %arg3[%c0_21, %c20, %c0_22] : memref<1x326x64xbf16, #tpu.memory_space<vmem>>, vector<1x288x64xbf16>
    %27 = vector.shape_cast %26 : vector<1x288x64xbf16> to vector<288x64xbf16>
    %c320 = arith.constant 320 : index
    %c0_23 = arith.constant 0 : index
    %28 = vector.load %arg4[%c320, %c0_23] : memref<576x64xbf16, #tpu.memory_space<vmem>>, vector<64x64xbf16>
    %cst_24 = arith.constant dense<0.000000e+00> : vector<288x64xf32>
    %29 = tpu.matmul %27, %28, %cst_24 {dimension_numbers = #tpu.dot_dimension_numbers<[1], [0], [0], [1], [0, 0, 1, 1], [], []>} : vector<288x64xbf16>, vector<64x64xbf16>, vector<288x64xf32> -> vector<288x64xf32>
    %30 = arith.addf %25, %29 : vector<288x64xf32>
    %c0_25 = arith.constant 0 : index
    %c36 = arith.constant 36 : index
    %c0_26 = arith.constant 0 : index
    %31 = vector.load %arg3[%c0_25, %c36, %c0_26] : memref<1x326x64xbf16, #tpu.memory_space<vmem>>, vector<1x288x64xbf16>
    %32 = vector.shape_cast %31 : vector<1x288x64xbf16> to vector<288x64xbf16>
    %c384 = arith.constant 384 : index
    %c0_27 = arith.constant 0 : index
    %33 = vector.load %arg4[%c384, %c0_27] : memref<576x64xbf16, #tpu.memory_space<vmem>>, vector<64x64xbf16>
    %cst_28 = arith.constant dense<0.000000e+00> : vector<288x64xf32>
    %34 = tpu.matmul %32, %33, %cst_28 {dimension_numbers = #tpu.dot_dimension_numbers<[1], [0], [0], [1], [0, 0, 1, 1], [], []>} : vector<288x64xbf16>, vector<64x64xbf16>, vector<288x64xf32> -> vector<288x64xf32>
    %35 = arith.addf %30, %34 : vector<288x64xf32>
    %c0_29 = arith.constant 0 : index
    %c37 = arith.constant 37 : index
    %c0_30 = arith.constant 0 : index
    %36 = vector.load %arg3[%c0_29, %c37, %c0_30] : memref<1x326x64xbf16, #tpu.memory_space<vmem>>, vector<1x288x64xbf16>
    %37 = vector.shape_cast %36 : vector<1x288x64xbf16> to vector<288x64xbf16>
    %c448 = arith.constant 448 : index
    %c0_31 = arith.constant 0 : index
    %38 = vector.load %arg4[%c448, %c0_31] : memref<576x64xbf16, #tpu.memory_space<vmem>>, vector<64x64xbf16>
    %cst_32 = arith.constant dense<0.000000e+00> : vector<288x64xf32>
    %39 = tpu.matmul %37, %38, %cst_32 {dimension_numbers = #tpu.dot_dimension_numbers<[1], [0], [0], [1], [0, 0, 1, 1], [], []>} : vector<288x64xbf16>, vector<64x64xbf16>, vector<288x64xf32> -> vector<288x64xf32>
    %40 = arith.addf %35, %39 : vector<288x64xf32>
    %c0_33 = arith.constant 0 : index
    %c38 = arith.constant 38 : index
    %c0_34 = arith.constant 0 : index
    %41 = vector.load %arg3[%c0_33, %c38, %c0_34] : memref<1x326x64xbf16, #tpu.memory_space<vmem>>, vector<1x288x64xbf16>
    %42 = vector.shape_cast %41 : vector<1x288x64xbf16> to vector<288x64xbf16>
    %c512 = arith.constant 512 : index
    %c0_35 = arith.constant 0 : index
    %43 = vector.load %arg4[%c512, %c0_35] : memref<576x64xbf16, #tpu.memory_space<vmem>>, vector<64x64xbf16>
    %cst_36 = arith.constant dense<0.000000e+00> : vector<288x64xf32>
    %44 = tpu.matmul %42, %43, %cst_36 {dimension_numbers = #tpu.dot_dimension_numbers<[1], [0], [0], [1], [0, 0, 1, 1], [], []>} : vector<288x64xbf16>, vector<64x64xbf16>, vector<288x64xf32> -> vector<288x64xf32>
    %45 = arith.addf %40, %44 : vector<288x64xf32>
    %c0_37 = arith.constant 0 : index
    %c0_38 = arith.constant 0 : index
    %46 = vector.load %arg5[%c0_37, %c0_38] : memref<1x64xf32, #tpu.memory_space<vmem>>, vector<1x64xf32>
    %47 = vector.broadcast %46 : vector<1x64xf32> to vector<288x64xf32>
    %48 = arith.addf %45, %47 : vector<288x64xf32>
    %c0_39 = arith.constant 0 : index
    %c0_40 = arith.constant 0 : index
    %c0_41 = arith.constant 0 : index
    %49 = vector.load %arg6[%c0_39, %c0_40, %c0_41] : memref<1x288x64xbf16, #tpu.memory_space<vmem>>, vector<1x288x64xbf16>
    %50 = vector.shape_cast %49 : vector<1x288x64xbf16> to vector<288x64xbf16>
    %51 = arith.extf %50 : vector<288x64xbf16> to vector<288x64xf32>
    %52 = arith.addf %48, %51 : vector<288x64xf32>
    %cst_42 = arith.constant 0.000000e+00 : f32
    %53 = vector.broadcast %cst_42 : f32 to vector<288x64xf32>
    %54 = arith.maximumf %52, %53 : vector<288x64xf32>
    %55 = arith.truncf %54 : vector<288x64xf32> to vector<288x64xbf16>
    %c0_43 = arith.constant 0 : index
    %c0_44 = arith.constant 0 : index
    %c0_45 = arith.constant 0 : index
    %56 = vector.load %arg7[%c0_43, %c0_44, %c0_45] : memref<1x288x64xbf16, #tpu.memory_space<vmem>>, vector<1x288x64xbf16>
    %57 = vector.shape_cast %56 : vector<1x288x64xbf16> to vector<288x64xbf16>
    %58 = vector.shape_cast %55 : vector<288x64xbf16> to vector<1x288x64xbf16>
    tpu.vector_store %arg7[%c0_43, %c0_44, %c0_45], %58 {strides = array<i32>} : memref<1x288x64xbf16, #tpu.memory_space<vmem>>, vector<1x288x64xbf16>,
    return
  }
  func.func @transform_0(%arg0: i32, %arg1: i32, %arg2: i32) -> (i32, i32, i32) {
    %c0_i32 = arith.constant 0 : i32
    %c0_i32_0 = arith.constant 0 : i32
    %c0_i32_1 = arith.constant 0 : i32
    return %arg0, %c0_i32, %c0_i32_0 : i32, i32, i32
  }
  func.func @transform_1(%arg0: i32, %arg1: i32, %arg2: i32) -> (i32, i32) {
    %c0_i32 = arith.constant 0 : i32
    %c0_i32_0 = arith.constant 0 : i32
    return %c0_i32, %arg1 : i32, i32
  }
  func.func @transform_2(%arg0: i32, %arg1: i32, %arg2: i32) -> (i32, i32) {
    %c0_i32 = arith.constant 0 : i32
    %c0_i32_0 = arith.constant 0 : i32
    return %c0_i32, %arg1 : i32, i32
  }
  func.func @transform_3(%arg0: i32, %arg1: i32, %arg2: i32) -> (i32, i32, i32) {
    %c0_i32 = arith.constant 0 : i32
    return %arg0, %arg2, %arg1 : i32, i32, i32
  }
  func.func @transform_4(%arg0: i32, %arg1: i32, %arg2: i32) -> (i32, i32, i32) {
    %c0_i32 = arith.constant 0 : i32
    return %arg0, %arg2, %arg1 : i32, i32, i32
  }
}

</mosaic_0001>

<bundles_post_ra>
// kernel: tpu_custom_call.1
= control target key start
LH: loop header
LB: loop body
LE: loop exit
PB: predicated region body
PF: predicated region fallthrough
CT: control target
= control target key end

     0   :  { %s5725_s15 = smov 0   ;;  %s5727_s16 = smov 0   ;;  %s7274_s0 = inlined_call_operand.vmem [shape: bf16[2,326,64], index: 0, kind: input, shape index: {}]   ;;  %s7275_s1 = inlined_call_operand.vmem [shape: bf16[576,64], index: 1, kind: input, shape index: {}]   ;;  %s7276_s2 = inlined_call_operand.vmem [shape: f32[1,64], index: 2, kind: input, shape index: {}]   ;;  %s7277_s3 = inlined_call_operand.vmem [shape: bf16[2,288,64], index: 3, kind: input, shape index: {}]   ;;  %s7278_s4 = inlined_call_operand.vmem [shape: bf16[2,288,64], index: 4, kind: output, shape index: {}]  }
   0x1   :  { %s5729_s17 = smov 0  }
   0x2 LB: > { %s33_s18 = sadd.s32 1, %s5694_s16  ;;  %p4522_p0 = scmp.ge.s32.totalorder %s5698_s17, 1  ;;  %s5698_s17 = sphi %s5729_s17, %s14_s17   ;;  %s5694_s16 = sphi %s5727_s16, %s7322_s16   ;;  %s5690_s15 = sphi %s5725_s15, %s7321_s15  }
   0x3   : > { %p35_p1 = scmp.ge.s32.totalorder %s33_s18, 2  ;;  %p224_p2 = scmp.lt.s32.totalorder %s5698_s17, 3 }
   0x5   : > { %s7324_s18 = smov (%p35_p1, %s33_s18), 0  ;;  %p225_p3 = pnand %p4522_p0, %p224_p2 }
   0x7   : > { %228 = sbr.rel (%p225_p3) target bundleno = 559 (0x22f), region = 36 }
   0xc   : > { %v5578_v0 = vld [vmem:[%s7275_s1 + $0x38] sm:$0xff]   ;;  %p276_p4 = scmp.lt.s32.totalorder %s5690_s15, 1  ;;  %v5579_v1 = vld [vmem:[%s7275_s1 + $0x30] sm:$0xff]   ;;  %v5580_v2 = vld [vmem:[%s7275_s1 + $0x28] sm:$0xff]   ;;  %vm461_vm0 = vsmask.f32 7424 }
   0xd   : > { %5148 = vmatprep.subr.bf16.mxu0 %v5578_v0  ;;  %5544 = vmatprep.subr.bf16.mxu1 %v5578_v0  ;;  %v5581_v3 = vld [vmem:[%s7275_s1 + $0x20] sm:$0xff]   ;;  %v5588_v14 = vld [vmem:[%s7275_s1 + $0x58] sm:$0xff]   ;;  %vm634_vm1 = vcmask 523264   ;;  %v5594_v48 = vld [vmem:[%s7275_s1 + $0x50] sm:$0xff]   ;;  %vm1115_vm2 = vcmask 1046528   ;;  %vm2396_vm3 = vcmask 1045504  }
   0xe   : > { %s7326_s15 = smov (!%p276_p4, %s5690_s15), 1  ;;  %5149 = vmatpush3.bf16.msra.mxu0 %v5578_v0  ;;  %5548 = vmatpush3.bf16.msra.mxu1 %v5578_v0  ;;  %v5589_v15 = vld [vmem:[%s7275_s1 + $0x18] sm:$0xff]   ;;  %v5595_v57 = vld [vmem:[%s7275_s1 + $0x10] sm:$0xff]   ;;  %vm1922_vm4 = vsmask.f32 6400  ;;  %vm3677_vm5 = vcmask 1044480  }
   0xf   : > { %5150 = vmatprep.subr.bf16.mxu0 %v5579_v1  ;;  %5545 = vmatprep.subr.bf16.mxu1 %v5579_v1  ;;  %s5552_s25 = smul.u32 164, %s7326_s15  ;;  %vm3203_vm6 = vsmask.f32 5376  ;;  %vm4337_vm7 = vcmask 519168  }
  0x11   : > { %s5761_s30 = scalar_lea.vmem %s7274_s0, %s5552_s25 }
  0x12   : > { %5151 = vmatpush3.bf16.msra.mxu0 %v5579_v1  ;;  %5549 = vmatpush3.bf16.msra.mxu1 %v5579_v1  ;;  %v315_v4 = vld [vmem:[%s5761_s30] sm:$0xf]  ;;  %v5765_v5 = vld [vmem:[%s5761_s30 + $0x4] sm:$0xf]  ;;  %v5771_v7 = vld [vmem:[%s5761_s30 + $0x8] sm:$0xff]  }
  0x13   : > { %5152 = vmatprep.subr.bf16.mxu0 %v5580_v2  ;;  %5546 = vmatprep.subr.bf16.mxu1 %v5580_v2  ;;  %v5768_v6 = vcombine.low %v315_v4, %v5765_v5  ;;  %v470_v10 = vshll.u32 %v5771_v7, 16  ;;  %v474_v11 = vshrl.u32 %v5771_v7, 16  ;;  %v5778_v12 = vld [vmem:[%s5761_s30 + $0x50] sm:$0xff]   ;;  %v5781_v13 = vld [vmem:[%s5761_s30 + $0x58] sm:$0xff]   ;;  %v5798_v24 = vld [vmem:[%s5761_s30 + $0x60] sm:$0xff]  }
  0x14   : > { %v5790_v16 = vld [vmem:[%s5761_s30 + $0x10] sm:$0xff]   ;;  %v542_v19 = vshll.u32 %v5778_v12, 16  ;;  %v546_v20 = vshrl.u32 %v5778_v12, 16  ;;  %v550_v21 = vshll.u32 %v5781_v13, 16  ;;  %v554_v22 = vshrl.u32 %v5781_v13, 16  ;;  %v5803_v28 = vld [vmem:[%s5761_s30 + $0x18] sm:$0xff]  }
  0x15   : > { %v463_v8 = vshrl.u32 %v5768_v6, 16  ;;  %v465_v9 = vshll.u32 %v5768_v6, 16  ;;  %v472_v18 = vrot.slane %v470_v10, 1  ;;  %v478_v23 = vshll.u32 %v5790_v16, 16  ;;  %v5811_v36 = vld [vmem:[%s5761_s30 + $0x68] sm:$0xff]   ;;  %v5815_v38 = vld [vmem:[%s5761_s30 + $0x20] sm:$0xff]  }
  0x16   : > { %5153 = vmatpush3.bf16.msra.mxu0 %v5580_v2  ;;  %5550 = vmatpush3.bf16.msra.mxu1 %v5580_v2  ;;  %v5800_v27 = vrot.slane %v542_v19, 1  ;;  %v552_v29 = vrot.slane %v550_v21, 1  ;;  %v558_v31 = vshll.u32 %v5798_v24, 16  ;;  %v482_v32 = vshrl.u32 %v5790_v16, 16  ;;  %v5820_v43 = vld [vmem:[%s5761_s30 + $0x70] sm:$0xff]   ;;  %v5840_v58 = vld [vmem:[%s5761_s30 + $0x28] sm:$0xff]  }
  0x17   : > { %5154 = vmatprep.subr.bf16.mxu0 %v5581_v3  ;;  %5547 = vmatprep.subr.bf16.mxu1 %v5581_v3  ;;  %v467_v17 = vrot.slane %v465_v9, 1  ;;  %v476_v26 = vor.u32 %v474_v11, %v472_v18  ;;  %v480_v30 = vrot.slane %v478_v23, 1  ;;  %v486_v35 = vshll.u32 %v5803_v28, 16  ;;  %v5853_v9 = vld [vmem:[%s5761_s30 + $0x30] sm:$0xff]   ;;  %v5857_v11 = vld [vmem:[%s5761_s30 + $0x80] sm:$0xff]   ;;  %v5601_v23 = vld [vmem:[%s7275_s1 + $0x8] sm:$0xff]  }
  0x18   : > { %v548_v34 = vor.u32 %v546_v20, %v5800_v27  ;;  %v562_v37 = vshrl.u32 %v5798_v24, 16  ;;  %v556_v39 = vor.u32 %v554_v22, %v552_v29  ;;  %v560_v41 = vrot.slane %v558_v31, 1  ;;  %v5600_v22 = vld [vmem:[%s7275_s1 + $0x48] sm:$0xff]  }
  0x19   : > { %v468_v25 = vor.u32 %v467_v17, %v463_v8  ;;  %v481_v40 = vsel %vm461_vm0, %v476_v26, %v480_v30  ;;  %v484_v42 = vor.u32 %v482_v32, %v480_v30  ;;  %v488_v45 = vrot.slane %v486_v35, 1 }
  0x1a   : > { %5155 = vmatpush3.bf16.msra.mxu0 %v5581_v3  ;;  %5551 = vmatpush3.bf16.msra.mxu1 %v5581_v3  ;;  %v553_v44 = vsel %vm461_vm0, %v548_v34, %v552_v29  ;;  %v566_v46 = vshll.u32 %v5811_v36, 16  ;;  %v490_v47 = vshrl.u32 %v5803_v28, 16  ;;  %v561_v49 = vsel %vm461_vm0, %v556_v39, %v560_v41  ;;  %v5849_v3 = vld [vmem:[%s5761_s30 + $0x78] sm:$0xff]  }
  0x1b   : > { %v473_v33 = vsel %vm461_vm0, %v468_v25, %v472_v18  ;;  %5236 = vmatprep.subr.bf16.mxu0 %v5588_v14  ;;  %5192 = vmatprep.subr.bf16.mxu1 %v5589_v15  ;;  %v564_v50 = vor.u32 %v562_v37, %v560_v41  ;;  %v494_v51 = vshll.u32 %v5815_v38, 16  ;;  %v570_v52 = vshrl.u32 %v5811_v36, 16  ;;  %v5874_v29 = vld [vmem:[%s5761_s30 + $0x38] sm:$0xff]   ;;  %v5882_v37 = vld [vmem:[%s5761_s30 + $0x88] sm:$0xff]  }
  0x1c   : > { %5156 = vmatprep.mubr.msk.bf16.mxu0 %vm634_vm1, %v473_v33  ;;  %5176 = vmatprep.mubr.msk.bf16.mxu1 %vm634_vm1, %v553_v44  ;;  %v489_v53 = vsel %vm461_vm0, %v484_v42, %v488_v45  ;;  %v568_v54 = vrot.slane %v566_v46, 1  ;;  %v492_v55 = vor.u32 %v490_v47, %v488_v45  ;;  %v574_v56 = vshll.u32 %v5820_v43, 16  ;;  %v5887_v44 = vld [vmem:[%s5761_s30 + $0x40] sm:$0xff]  }
  0x1d   : > { %5157 = vmatmul.mubr.msk.bf16.vlgmr.msra.gmra.mxu0 %vm634_vm1, %v481_v40  ;;  %5177 = vmatmul.mubr.msk.bf16.vlgmr.msra.gmra.mxu1 %vm634_vm1, %v561_v49  ;;  %v496_v59 = vrot.slane %v494_v51, 1  ;;  %v498_v60 = vshrl.u32 %v5815_v38, 16  ;;  %v502_v0 = vshll.u32 %v5840_v58, 16  ;;  %v578_v4 = vshrl.u32 %v5820_v43, 16  ;;  %v5606_v46 = vld [vmem:[%s7275_s1] sm:$0xff]  }
  0x1e   : > { %5237 = vmatpush3.bf16.msra.mxu0 %v5588_v14  ;;  %5160 = vmatprep.mubr.msk.bf16.mxu0 %vm634_vm1, %v489_v53  ;;  %v569_v61 = vsel %vm461_vm0, %v564_v50, %v568_v54  ;;  %v572_v62 = vor.u32 %v570_v52, %v568_v54  ;;  %v576_v63 = vrot.slane %v574_v56, 1  ;;  %v506_v10 = vshrl.u32 %v5840_v58, 16  ;;  %v5605_v49 = vld [vmem:[%s5761_s30 + $0x90] ss:$0 sps:$4 sm:$0x11]   ;;  %v5607_v51 = vld [vmem:[%s7275_s1 + $0x40] sm:$0xff]  }
  0x1f   : > { %5238 = vmatprep.subr.bf16.mxu0 %v5594_v48  ;;  %5193 = vmatpush3.bf16.msra.mxu1 %v5589_v15  ;;  %v497_v1 = vsel %vm461_vm0, %v492_v55, %v496_v59  ;;  %v500_v2 = vor.u32 %v498_v60, %v496_v59  ;;  %v504_v8 = vrot.slane %v502_v0, 1  ;;  %v582_v17 = vshll.u32 %v5849_v3, 16  ;;  %v5903_v55 = vld [vmem:[%s5761_s30 + $0x48] sm:$0xff]  }
  0x20   : > { %5194 = vmatprep.subr.bf16.mxu1 %v5595_v57  ;;  %5180 = vmatprep.mubr.msk.bf16.mxu1 %vm634_vm1, %v569_v61  ;;  %v577_v14 = vsel %vm461_vm0, %v572_v62, %v576_v63  ;;  %v580_v15 = vor.u32 %v578_v4, %v576_v63  ;;  %v586_v18 = vshrl.u32 %v5849_v3, 16  ;;  %v510_v20 = vshll.u32 %v5853_v9, 16  ;;  %v5609_v4 = vld [vmem:[%s7275_s1 + $0x78] sm:$0xff]  }
  0x21   : > { %v505_v19 = vsel %vm461_vm0, %v500_v2, %v504_v8  ;;  %v590_v21 = vshll.u32 %v5857_v11, 16  ;;  %v584_v25 = vrot.slane %v582_v17, 1  ;;  %v508_v26 = vor.u32 %v506_v10, %v504_v8  ;;  %v1103_v8 = vld [vmem:[%s5761_s30] sm:$0xe]  ;;  %v5611_v10 = vld [vmem:[%s7275_s1 + $0x98] sm:$0xff]  }
  0x22   : > { %5239 = vmatpush3.bf16.msra.mxu0 %v5594_v48  ;;  %v512_v30 = vrot.slane %v510_v20, 1  ;;  %v514_v34 = vshrl.u32 %v5853_v9, 16  ;;  %v518_v35 = vshll.u32 %v5874_v29, 16  ;;  %v594_v39 = vshrl.u32 %v5857_v11, 16 }
  0x23   : > { %5195 = vmatpush3.bf16.msra.mxu1 %v5595_v57  ;;  %v592_v31 = vrot.slane %v590_v21, 1  ;;  %5240 = vmatprep.subr.bf16.mxu0 %v5600_v22  ;;  %v585_v32 = vsel %vm461_vm0, %v580_v15, %v584_v25  ;;  %v588_v33 = vor.u32 %v586_v18, %v584_v25  ;;  %v522_v45 = vshrl.u32 %v5874_v29, 16 }
  0x24   : > { %5196 = vmatprep.subr.bf16.mxu1 %v5601_v23  ;;  %v513_v40 = vsel %vm461_vm0, %v508_v26, %v512_v30  ;;  %v516_v41 = vor.u32 %v514_v34, %v512_v30  ;;  %v520_v42 = vrot.slane %v518_v35, 1  ;;  %v598_v48 = vshll.u32 %v5882_v37, 16 }
  0x25   : > { %5161 = vmatmul.mubr.msk.bf16.gmra.mxu0 %vm634_vm1, %v497_v1  ;;  %5181 = vmatmul.mubr.msk.bf16.gmra.mxu1 %vm634_vm1, %v577_v14  ;;  %v596_v47 = vor.u32 %v594_v39, %v592_v31  ;;  %v602_v50 = vshrl.u32 %v5882_v37, 16  ;;  %v593_v52 = vsel %vm461_vm0, %v588_v33, %v592_v31  ;;  %v526_v54 = vshll.u32 %v5887_v44, 16  ;;  %v5612_v31 = vld [vmem:[%s7275_s1 + $0x70] sm:$0xff]   ;;  %v5614_v33 = vld [vmem:[%s7275_s1 + $0x68] sm:$0xff]  }
  0x26   : > { %5164 = vmatprep.mubr.msk.bf16.mxu0 %vm634_vm1, %v505_v19  ;;  %5241 = vmatpush3.bf16.msra.mxu0 %v5600_v22  ;;  %v521_v53 = vsel %vm461_vm0, %v516_v41, %v520_v42  ;;  %v600_v56 = vrot.slane %v598_v48, 1  ;;  %v606_v57 = vshll.u32 %v5605_v49, 16  ;;  %v524_v59 = vor.u32 %v522_v45, %v520_v42  ;;  %v5613_v39 = vld [vmem:[%s7275_s1 + $0x90] sm:$0xff]   ;;  %v5615_v41 = vld [vmem:[%s7275_s1 + $0x88] sm:$0xff]   ;;  %v5975_v42 = vld [vmem:[%s7275_s1 + $0xb8] sm:$0xff]  }
  0x27   : > { %5184 = vmatprep.mubr.msk.bf16.mxu1 %vm634_vm1, %v585_v32  ;;  %5197 = vmatpush3.bf16.msra.mxu1 %v5601_v23  ;;  %v528_v60 = vrot.slane %v526_v54, 1  ;;  %v530_v61 = vshrl.u32 %v5887_v44, 16  ;;  %v534_v63 = vshll.u32 %v5903_v55, 16  ;;  %v538_v17 = vshrl.u32 %v5903_v55, 16  ;;  %v5992_v48 = vld [vmem:[%s7275_s1 + $0xd8] sm:$0xff]  }
  0x28   : > { %5198 = vmatprep.subr.bf16.mxu1 %v5606_v46  ;;  %5242 = vmatprep.subr.bf16.mxu0 %v5607_v51  ;;  %v601_v62 = vsel %vm461_vm0, %v596_v47, %v600_v56  ;;  %v604_v0 = vor.u32 %v602_v50, %v600_v56  ;;  %v608_v1 = vrot.slane %v606_v57, 1  ;;  %v4589_v19 = vcombine.low %v1103_v8, %v5765_v5  ;;  %v2384_v54 = vld [vmem:[%s5761_s30 + $0x8] sm:$0xc]  ;;  %v6020_v56 = vld [vmem:[%s5761_s30 + $0x10] sm:$0xff]  }
  0x29   : > { %v532_v2 = vor.u32 %v530_v61, %v528_v60  ;;  %v536_v14 = vrot.slane %v534_v63, 1  ;;  %v529_v15 = vsel %vm461_vm0, %v524_v59, %v528_v60  ;;  %v1117_v23 = vrot.slane %v5771_v7, 1  ;;  %v6024_v60 = vld [vmem:[%s5761_s30 + $0x18] sm:$0xff]   ;;  %v6027_v61 = vld [vmem:[%s5761_s30 + $0x20] sm:$0xff]   ;;  %v6032_v63 = vld [vmem:[%s5761_s30 + $0x28] sm:$0xff]  }
  0x2a   : > { %5243 = vmatpush3.bf16.msra.mxu0 %v5607_v51  ;;  %v609_v20 = vsel %vm461_vm0, %v604_v0, %v608_v1  ;;  %v1116_v22 = vrot.slane %v4589_v19, 1  ;;  %v1149_v5 = vrot.slane %v5882_v37, 1  ;;  %v1151_v30 = vrot.slane %v5605_v49, 1  ;;  %v6061_v19 = vld [vmem:[%s5761_s30 + $0x40] sm:$0xff]  }
  0x2b   : > { %5199 = vmatpush3.bf16.msra.mxu1 %v5606_v46  ;;  %5324 = vmatprep.subr.bf16.mxu0 %v5611_v10  ;;  %v537_v18 = vsel %vm461_vm0, %v532_v2, %v536_v14  ;;  %v540_v21 = vor.u32 %v538_v17, %v536_v14  ;;  %v1119_v32 = vrot.slane %v5790_v16, 1  ;;  %v5617_v46 = vld [vmem:[%s7275_s1 + $0x80] sm:$0xff]   ;;  %v1129_v47 = vrot.slane %v5874_v29, 1  ;;  %v6038_v2 = vld [vmem:[%s5761_s30 + $0x30] sm:$0xff]  }
  0x2c   : > { %5280 = vmatprep.subr.bf16.mxu1 %v5609_v4  ;;  %v1118_v26 = vsel %vm1115_vm2, %v1116_v22, %v1117_v23  ;;  %v2400_v0 = vrot.slane %v6024_v60, 2  ;;  %v2402_v1 = vrot.slane %v6027_v61, 2  ;;  %v1139_v8 = vrot.slane %v5798_v24, 1 }
  0x2d   : > { %5165 = vmatmul.mubr.msk.bf16.gmra.mxu0 %vm634_vm1, %v513_v40  ;;  %5185 = vmatmul.mubr.msk.bf16.gmra.mxu1 %vm634_vm1, %v593_v52  ;;  %v545_v25 = vsel %vm461_vm0, %v540_v21, %v5800_v27  ;;  %v1121_v27 = vrot.slane %v5803_v28, 1  ;;  %v1120_v34 = vsel %vm1115_vm2, %v1117_v23, %v1119_v32  ;;  %v1125_v40 = vrot.slane %v5840_v58, 1 }
  0x2e   : > { %5168 = vmatprep.mubr.msk.bf16.mxu0 %vm634_vm1, %v521_v53  ;;  %5188 = vmatprep.mubr.msk.bf16.mxu1 %vm634_vm1, %v601_v62  ;;  %v1135_v53 = vrot.slane %v5778_v12, 1  ;;  %v1141_v17 = vrot.slane %v5811_v36, 1  ;;  %v2406_v21 = vrot.slane %v6038_v2, 2 }
  0x2f   : > { %v1122_v35 = vsel %vm1115_vm2, %v1119_v32, %v1121_v27  ;;  %v2410_v32 = vrot.slane %v6061_v19, 2 }
  0x35   : > { %5169 = vmatmul.mubr.msk.bf16.gmra.mxu0 %vm634_vm1, %v529_v15  ;;  %5189 = vmatmul.mubr.msk.bf16.gmra.mxu1 %vm634_vm1, %v609_v20  ;;  %v6052_v15 = vsel %vm2396_vm3, %v2400_v0, %v2402_v1  ;;  %v6064_v20 = vld [vmem:[%s5761_s30 + $0x48] sm:$0xff]  }
  0x36   : > { %5172 = vmatprep.mubr.msk.bf16.mxu0 %vm634_vm1, %v537_v18  ;;  %5200 = vmatprep.mubr.msk.bf16.mxu1 %vm634_vm1, %v5768_v6  ;;  %v5943_v6 = vsel %vm1115_vm2, %v1149_v5, %v1151_v30  ;;  %v2404_v18 = vrot.slane %v6032_v63, 2 }
  0x38   : > { %v6069_v23 = vsel %vm2396_vm3, %v2402_v1, %v2404_v18 }
  0x3d   : > { %5173 = vmatmul.mubr.msk.bf16.gmra.mxu0 %vm634_vm1, %v545_v25  ;;  %5201 = vmatmul.mubr.msk.bf16.vlgmr.msra.gmra.mxu1 %vm634_vm1, %v5771_v7  ;;  %v5616_v7 = vld [vmem:[%s7275_s1 + $0x60] sm:$0xff]   ;;  %v1444_v25 = vld [vmem:[%s5761_s30 + $0x8] sm:$0xe] }
  0x3e   : > { %5244 = vmatprep.mubr.msk.bf16.mxu0 %vm634_vm1, %v1118_v26  ;;  %5204 = vmatprep.mubr.msk.bf16.mxu1 %vm634_vm1, %v5790_v16  ;;  %v1123_v16 = vrot.slane %v5815_v38, 1  ;;  %v6074_v26 = vsel %vm2396_vm3, %v2404_v18, %v2406_v21  ;;  %v1944_v18 = vshll.u32 %v6024_v60, 16 }
  0x3f   : > { %5281 = vmatpush3.bf16.msra.mxu1 %v5609_v4 }
  0x40   : > { %5282 = vmatprep.subr.bf16.mxu1 %v5612_v31  ;;  %v1124_v45 = vsel %vm1115_vm2, %v1121_v27, %v1123_v16  ;;  %v2412_v27 = vrot.slane %v6064_v20, 2 }
  0x43   : > { %5283 = vmatpush3.bf16.msra.mxu1 %v5612_v31  ;;  %v6081_v31 = vld [vmem:[%s5761_s30 + $0x50] sm:$0xff]  }
  0x44   : > { %5284 = vmatprep.subr.bf16.mxu1 %v5614_v33 }
  0x45   : > { %5245 = vmatmul.mubr.msk.bf16.vlgmr.msra.gmra.mxu0 %vm634_vm1, %v1120_v34  ;;  %5205 = vmatmul.mubr.msk.bf16.gmra.mxu1 %vm634_vm1, %v5803_v28  ;;  %v1126_v28 = vsel %vm1115_vm2, %v1123_v16, %v1125_v40 }
  0x46   : > { %5325 = vmatpush3.bf16.msra.mxu0 %v5611_v10  ;;  %5248 = vmatprep.mubr.msk.bf16.mxu0 %vm634_vm1, %v1122_v35  ;;  %v6046_v10 = vld [vmem:[%s5761_s30 + $0x38] sm:$0xff]   ;;  %v6093_v35 = vsel %vm2396_vm3, %v2410_v32, %v2412_v27 }
  0x47   : > { %5326 = vmatprep.subr.bf16.mxu0 %v5613_v39  ;;  %5208 = vmatprep.mubr.msk.bf16.mxu1 %vm634_vm1, %v5815_v38  ;;  %v1127_v38 = vrot.slane %v5853_v9, 1  ;;  %v2408_v22 = vrot.slane %v6046_v10, 2 }
  0x48   : > { %5285 = vmatpush3.bf16.msra.mxu1 %v5614_v33  ;;  %v6086_v33 = vld [vmem:[%s5761_s30 + $0x58] sm:$0xff]  }
  0x49   : > { %5286 = vmatprep.subr.bf16.mxu1 %v5616_v7  ;;  %v1128_v49 = vsel %vm1115_vm2, %v1125_v40, %v1127_v38  ;;  %v1130_v50 = vsel %vm1115_vm2, %v1127_v38, %v1129_v47  ;;  %v6077_v30 = vsel %vm2396_vm3, %v2406_v21, %v2408_v22  ;;  %v6090_v34 = vsel %vm2396_vm3, %v2408_v22, %v2410_v32 }
  0x4a   : > { %5327 = vmatpush3.bf16.msra.mxu0 %v5613_v39  ;;  %v2414_v39 = vrot.slane %v6081_v31, 2  ;;  %v2416_v16 = vrot.slane %v6086_v33, 2  ;;  %v1145_v40 = vrot.slane %v5849_v3, 1  ;;  %v1585_v32 = vrot.slane %v6024_v60, 1 }
  0x4b   : > { %5328 = vmatprep.subr.bf16.mxu0 %v5615_v41 }
  0x4c   : > { %5287 = vmatpush3.bf16.msra.mxu1 %v5616_v7  ;;  %v1143_v7 = vrot.slane %v5820_v43, 1 }
  0x4d   : > { %5249 = vmatmul.mubr.msk.bf16.gmra.mxu0 %vm634_vm1, %v1124_v45  ;;  %5368 = vmatprep.subr.bf16.mxu1 %v5975_v42  ;;  %v6103_v45 = vsel %vm2396_vm3, %v2412_v27, %v2414_v39  ;;  %v1587_v27 = vrot.slane %v6027_v61, 1 }
  0x4e   : > { %5252 = vmatprep.mubr.msk.bf16.mxu0 %vm634_vm1, %v1126_v28  ;;  %5329 = vmatpush3.bf16.msra.mxu0 %v5615_v41  ;;  %v1147_v28 = vrot.slane %v5857_v11, 1 }
  0x4f   : > { %5209 = vmatmul.mubr.msk.bf16.gmra.mxu1 %vm634_vm1, %v5840_v58  ;;  %5330 = vmatprep.subr.bf16.mxu0 %v5617_v46  ;;  %v1131_v58 = vrot.slane %v5887_v44, 1 }
  0x50   : > { %5212 = vmatprep.mubr.msk.bf16.mxu1 %vm634_vm1, %v5853_v9  ;;  %v1133_v9 = vrot.slane %v5903_v55, 1 }
  0x51   : > { %v1132_v51 = vsel %vm1115_vm2, %v1129_v47, %v1131_v58  ;;  %v6112_v47 = vld [vmem:[%s5761_s30 + $0x60] sm:$0xff]  }
  0x52   : > { %5331 = vmatpush3.bf16.msra.mxu0 %v5617_v46  ;;  %v1134_v52 = vsel %vm1115_vm2, %v1131_v58, %v1133_v9  ;;  %v1136_v59 = vsel %vm1115_vm2, %v1133_v9, %v1135_v53  ;;  %v6109_v46 = vsel %vm2396_vm3, %v2414_v39, %v2416_v16  ;;  %v1146_v58 = vsel %vm1115_vm2, %v1143_v7, %v1145_v40  ;;  %v6167_v39 = vld [vmem:[%s5761_s30 + $0x80] sm:$0xff]  }
  0x53   : > { %5412 = vmatprep.subr.bf16.mxu0 %v5992_v48  ;;  %v1932_v9 = vshrl.u32 %v6020_v56, 16 }
  0x55   : > { %5253 = vmatmul.mubr.msk.bf16.gmra.mxu0 %vm634_vm1, %v1128_v49  ;;  %v1144_v49 = vsel %vm1115_vm2, %v1141_v17, %v1143_v7  ;;  %v1934_v1 = vrot.slane %v1932_v9, 1 }
  0x56   : > { %5256 = vmatprep.mubr.msk.bf16.mxu0 %vm634_vm1, %v1130_v50  ;;  %v6116_v50 = vld [vmem:[%s5761_s30 + $0x68] sm:$0xff]  }
  0x57   : > { %5213 = vmatmul.mubr.msk.bf16.gmra.mxu1 %vm634_vm1, %v5874_v29  ;;  %v1137_v29 = vrot.slane %v5781_v13, 1 }
  0x58   : > { %5216 = vmatprep.mubr.msk.bf16.mxu1 %vm634_vm1, %v5887_v44  ;;  %v1445_v44 = vld [vmem:[%s5761_s30 + $0xc] sm:$0xf] }
  0x59   : > { %v4676_v57 = vcombine.low %v2384_v54, %v1445_v44  ;;  %v1138_v62 = vsel %vm1115_vm2, %v1135_v53, %v1137_v29  ;;  %v4612_v41 = vcombine.low %v1444_v25, %v1445_v44  ;;  %v1583_v44 = vrot.slane %v6020_v56, 1 }
  0x5a   : > { %v1950_v25 = vshrl.u32 %v6027_v61, 16 }
  0x5b   : > { %v1924_v38 = vshrl.u32 %v4612_v41, 16 }
  0x5d   : > { %5257 = vmatmul.mubr.msk.bf16.gmra.mxu0 %vm634_vm1, %v1132_v51  ;;  %v1935_v51 = vshll.u32 %v6020_v56, 16 }
  0x5e   : > { %5260 = vmatprep.mubr.msk.bf16.mxu0 %vm634_vm1, %v1134_v52  ;;  %v2420_v52 = vrot.slane %v6116_v50, 2 }
  0x5f   : > { %5217 = vmatmul.mubr.msk.bf16.gmra.mxu1 %vm634_vm1, %v5903_v55  ;;  %v2398_v55 = vrot.slane %v6020_v56, 2 }
  0x60   : > { %5220 = vmatprep.mubr.msk.bf16.mxu1 %vm634_vm1, %v5778_v12  ;;  %v2397_v12 = vrot.slane %v4676_v57, 2  ;;  %v6137_v57 = vld [vmem:[%s5761_s30 + $0x70] sm:$0xff]  }
  0x61   : > { %v6049_v14 = vsel %vm2396_vm3, %v2398_v55, %v2400_v0 }
  0x62   : > { %v6041_v4 = vsel %vm2396_vm3, %v2397_v12, %v2398_v55  ;;  %v1150_v55 = vsel %vm1115_vm2, %v1147_v28, %v1149_v5  ;;  %v6144_v12 = vld [vmem:[%s5761_s30 + $0x78] sm:$0xff]   ;;  %v1941_v5 = vshrl.u32 %v6024_v60, 16  ;;  %v1588_v60 = vsel %vm1115_vm2, %v1585_v32, %v1587_v27 }
  0x64   : > { %v1943_v7 = vrot.slane %v1941_v5, 1 }
  0x65   : > { %5261 = vmatmul.mubr.msk.bf16.gmra.mxu0 %vm634_vm1, %v1136_v59  ;;  %v1148_v59 = vsel %vm1115_vm2, %v1145_v40, %v1147_v28  ;;  %v6170_v40 = vld [vmem:[%s5761_s30 + $0x88] sm:$0xff]  }
  0x66   : > { %5264 = vmatprep.mubr.msk.bf16.mxu0 %vm634_vm1, %v1138_v62  ;;  %v1926_v62 = vrot.slane %v1924_v38, 1  ;;  %v2426_v38 = vrot.slane %v6167_v39, 2 }
  0x67   : > { %5221 = vmatmul.mubr.msk.bf16.gmra.mxu1 %vm634_vm1, %v5781_v13  ;;  %v1140_v13 = vsel %vm1115_vm2, %v1137_v29, %v1139_v8  ;;  %v1582_v29 = vrot.slane %v4612_v41, 1 }
  0x68   : > { %5224 = vmatprep.mubr.msk.bf16.mxu1 %vm634_vm1, %v5798_v24  ;;  %v1142_v24 = vsel %vm1115_vm2, %v1139_v8, %v1141_v17  ;;  %v2422_v8 = vrot.slane %v6137_v57, 2 }
  0x69   : > { %v1584_v56 = vsel %vm1115_vm2, %v1582_v29, %v1583_v44  ;;  %v1968_v29 = vshrl.u32 %v6038_v2, 16 }
  0x6a   : > { %v6151_v17 = vsel %vm2396_vm3, %v2420_v52, %v2422_v8 }
  0x6d   : > { %5265 = vmatmul.mubr.msk.bf16.gmra.mxu0 %vm634_vm1, %v1140_v13 }
  0x6e   : > { %5268 = vmatprep.mubr.msk.bf16.mxu0 %vm634_vm1, %v1142_v24  ;;  %v1953_v24 = vshll.u32 %v6027_v61, 16  ;;  %v5629_v61 = vld [vmem:[%s7275_s1 + $0xb0] sm:$0xff]  }
  0x6f   : > { %5225 = vmatmul.mubr.msk.bf16.gmra.mxu1 %vm634_vm1, %v5811_v36  ;;  %v1927_v36 = vshll.u32 %v4612_v41, 16  ;;  %v1952_v41 = vrot.slane %v1950_v25, 1  ;;  %v5641_v25 = vld [vmem:[%s7275_s1 + $0xa0] sm:$0xff]  }
  0x70   : > { %5228 = vmatprep.mubr.msk.bf16.mxu1 %vm634_vm1, %v5820_v43  ;;  %v2418_v43 = vrot.slane %v6112_v47, 2  ;;  %v1955_v28 = vrot.slane %v1953_v24, 2 }
  0x71   : > { %v1929_v0 = vrot.slane %v1927_v36, 2  ;;  %v2428_v36 = vrot.slane %v6170_v40, 2 }
  0x72   : > { %v6125_v53 = vsel %vm2396_vm3, %v2416_v16, %v2418_v43  ;;  %v6129_v54 = vsel %vm2396_vm3, %v2418_v43, %v2420_v52  ;;  %v1946_v16 = vrot.slane %v1944_v18, 2  ;;  %v1959_v43 = vshrl.u32 %v6032_v63, 16 }
  0x73   : > { %v1930_v22 = vor.u32 %v1929_v0, %v1926_v62  ;;  %v1956_v52 = vor.u32 %v1955_v28, %v1952_v41  ;;  %v5635_v62 = vld [vmem:[%s7275_s1 + $0xa8] sm:$0xff]   ;;  %v6202_v0 = vld [vmem:[%s5761_s30 + $0x90] sm:$0xff]   ;;  %v1986_v41 = vshrl.u32 %v6061_v19, 16  ;;  %v1989_v28 = vshll.u32 %v6061_v19, 16 }
  0x74   : > { %v1947_v9 = vor.u32 %v1946_v16, %v1943_v7  ;;  %v1980_v7 = vshll.u32 %v6046_v10, 16 }
  0x75   : > { %5269 = vmatmul.mubr.msk.bf16.gmra.mxu0 %vm634_vm1, %v1144_v49  ;;  %v1586_v49 = vsel %vm1115_vm2, %v1583_v44, %v1585_v32  ;;  %v1971_v44 = vshll.u32 %v6038_v2, 16 }
  0x76   : > { %5272 = vmatprep.mubr.msk.bf16.mxu0 %vm634_vm1, %v1146_v58 }
  0x77   : > { %5229 = vmatmul.mubr.msk.bf16.gmra.mxu1 %vm634_vm1, %v5849_v3  ;;  %v1937_v3 = vrot.slane %v1935_v51, 2  ;;  %v1962_v51 = vshll.u32 %v6032_v63, 16  ;;  %v1973_v5 = vrot.slane %v1971_v44, 2 }
  0x78   : > { %5232 = vmatprep.mubr.msk.bf16.mxu1 %vm634_vm1, %v5857_v11  ;;  %v2424_v11 = vrot.slane %v6144_v12, 2 }
  0x79   : > { %v1938_v13 = vor.u32 %v1937_v3, %v1934_v1  ;;  %v1961_v3 = vrot.slane %v1959_v43, 1 }
  0x7a   : > { %v6157_v21 = vsel %vm2396_vm3, %v2422_v8, %v2424_v11  ;;  %v6183_v58 = vsel %vm2396_vm3, %v2424_v11, %v2426_v38  ;;  %v1964_v8 = vrot.slane %v1962_v51, 2  ;;  %v6206_v11 = vld [vmem:[%s5761_s30 + $0x98] ss:$0 sps:$4 sm:$0x33]   ;;  %v1988_v51 = vrot.slane %v1986_v41, 1 }
  0x7b   : > { %v1948_v1 = vsel %vm1922_vm4, %v1938_v13, %v1947_v9 }
  0x7c   : > { %v1965_v32 = vor.u32 %v1964_v8, %v1961_v3  ;;  %v2007_v3 = vshll.u32 %v6081_v31, 16  ;;  %v6262_v8 = vld [vmem:[%s7275_s1 + $0x118] sm:$0xff]  }
  0x7d   : > { %5273 = vmatmul.mubr.msk.bf16.gmra.mxu0 %vm634_vm1, %v1148_v59  ;;  %v1589_v59 = vrot.slane %v6032_v63, 1  ;;  %v5630_v63 = vld [vmem:[%s7275_s1 + $0xd0] sm:$0xff]  }
  0x7e   : > { %5276 = vmatprep.mubr.msk.bf16.mxu0 %vm634_vm1, %v1150_v55  ;;  %v1591_v55 = vrot.slane %v6038_v2, 1  ;;  %v2430_v2 = vrot.slane %v6202_v0, 2 }
  0x7f   : > { %5233 = vmatmul.mubr.msk.bf16.gmra.mxu1 %vm634_vm1, %v5882_v37  ;;  %v1939_v37 = vsel %vm1922_vm4, %v1930_v22, %v1938_v13  ;;  %v1590_v18 = vsel %vm1115_vm2, %v1587_v27, %v1589_v59  ;;  %v2432_v22 = vrot.slane %v6206_v11, 2  ;;  %v1977_v27 = vshrl.u32 %v6046_v10, 16 }
  0x80   : > { %5288 = vmatprep.mubr.msk.bf16.mxu1 %vm634_vm1, %v1584_v56  ;;  %v1957_v56 = vsel %vm1922_vm4, %v1947_v9, %v1956_v52  ;;  %v1592_v13 = vsel %vm1115_vm2, %v1589_v59, %v1591_v55  ;;  %v6221_v24 = vsel %vm2396_vm3, %v2428_v36, %v2430_v2  ;;  %v1982_v9 = vrot.slane %v1980_v7, 2 }
  0x81   : > { %v6228_v16 = vsel %vm2396_vm3, %v2430_v2, %v2432_v22  ;;  %v1995_v59 = vshrl.u32 %v6064_v20, 16  ;;  %v6272_v2 = vld [vmem:[%s5761_s30 + $0x18] sm:$0xff]  }
  0x85   : > { %5277 = vmatmul.mubr.msk.bf16.gmra.mxu0 %vm634_vm1, %v5943_v6  ;;  %v6189_v6 = vsel %vm2396_vm3, %v2426_v38, %v2428_v36  ;;  %v1593_v38 = vrot.slane %v6046_v10, 1  ;;  %v6242_v36 = vld [vmem:[%s7275_s1 + $0xf8] sm:$0xff]   ;;  %v5642_v10 = vld [vmem:[%s7275_s1 + $0xc0] sm:$0xff]  }
  0x86   : > { %5332 = vmatprep.mubr.msk.bf16.mxu0 %vm634_vm1, %v1939_v37 }
  0x87   : > { %5289 = vmatmul.mubr.msk.bf16.vlgmr.msra.gmra.mxu1 %vm634_vm1, %v1586_v49  ;;  %v1595_v49 = vrot.slane %v6061_v19, 1  ;;  %v1594_v19 = vsel %vm1115_vm2, %v1591_v55, %v1593_v38 }
  0x88   : > { %5292 = vmatprep.mubr.msk.bf16.mxu1 %vm634_vm1, %v1588_v60  ;;  %5369 = vmatpush3.bf16.msra.mxu1 %v5975_v42  ;;  %v1970_v42 = vrot.slane %v1968_v29, 1  ;;  %v1966_v60 = vsel %vm1922_vm4, %v1956_v52, %v1965_v32  ;;  %v1991_v29 = vrot.slane %v1989_v28, 2 }
  0x89   : > { %5370 = vmatprep.subr.bf16.mxu1 %v5629_v61  ;;  %v1596_v52 = vsel %vm1115_vm2, %v1593_v38, %v1595_v49 }
  0x8a   : > { %v1974_v37 = vor.u32 %v1973_v5, %v1970_v42  ;;  %v1992_v55 = vor.u32 %v1991_v29, %v1988_v51  ;;  %v6267_v42 = vld [vmem:[%s5761_s30 + $0x14] sm:$0xf]  ;;  %v3665_v5 = vld [vmem:[%s5761_s30 + $0x10] sm:$0x8]  ;;  %v2022_v51 = vshrl.u32 %v6112_v47, 16  ;;  %v2025_v29 = vshll.u32 %v6112_v47, 16 }
  0x8c   : > { %5371 = vmatpush3.bf16.msra.mxu1 %v5629_v61  ;;  %v1979_v61 = vrot.slane %v1977_v27, 1  ;;  %v1975_v43 = vsel %vm1922_vm4, %v1965_v32, %v1974_v37  ;;  %v6277_v27 = vld [vmem:[%s5761_s30 + $0x20] sm:$0xff]  }
  0x8d   : > { %5333 = vmatmul.mubr.msk.bf16.vlgmr.msra.gmra.mxu0 %vm634_vm1, %v1948_v1  ;;  %5372 = vmatprep.subr.bf16.mxu1 %v5635_v62  ;;  %v2004_v1 = vshrl.u32 %v6081_v31, 16 }
  0x8e   : > { %5413 = vmatpush3.bf16.msra.mxu0 %v5992_v48  ;;  %5336 = vmatprep.mubr.msk.bf16.mxu0 %vm634_vm1, %v1957_v56  ;;  %v5636_v48 = vld [vmem:[%s7275_s1 + $0xc8] sm:$0xff]   ;;  %v1983_v44 = vor.u32 %v1982_v9, %v1979_v61  ;;  %v1597_v56 = vrot.slane %v6064_v20, 1  ;;  %v2013_v61 = vshrl.u32 %v6086_v33, 16  ;;  %v2016_v9 = vshll.u32 %v6086_v33, 16 }
  0x8f   : > { %5293 = vmatmul.mubr.msk.bf16.gmra.mxu1 %vm634_vm1, %v1590_v18  ;;  %5414 = vmatprep.subr.bf16.mxu0 %v5630_v63  ;;  %v4763_v18 = vcombine.low %v3665_v5, %v6267_v42  ;;  %v2006_v32 = vrot.slane %v2004_v1, 1  ;;  %v6306_v1 = vld [vmem:[%s5761_s30 + $0x30] sm:$0xff]   ;;  %v2027_v5 = vrot.slane %v2025_v29, 2 }
  0x90   : > { %5296 = vmatprep.mubr.msk.bf16.mxu1 %vm634_vm1, %v1592_v13  ;;  %5373 = vmatpush3.bf16.msra.mxu1 %v5635_v62  ;;  %v1998_v62 = vshll.u32 %v6064_v20, 16  ;;  %v1984_v22 = vsel %vm1922_vm4, %v1974_v37, %v1983_v44  ;;  %v1997_v13 = vrot.slane %v1995_v59, 1  ;;  %v1993_v7 = vsel %vm1922_vm4, %v1983_v44, %v1992_v55 }
  0x91   : > { %5374 = vmatprep.subr.bf16.mxu1 %v5641_v25  ;;  %v2009_v20 = vrot.slane %v2007_v3, 2  ;;  %v3678_v41 = vrot.slane %v4763_v18, 3  ;;  %v1598_v28 = vsel %vm1115_vm2, %v1595_v49, %v1597_v56  ;;  %v2015_v59 = vrot.slane %v2013_v61, 1 }
  0x92   : > { %5415 = vmatpush3.bf16.msra.mxu0 %v5630_v63  ;;  %v1599_v63 = vrot.slane %v6081_v31, 1  ;;  %v3679_v31 = vrot.slane %v6272_v2, 3 }
  0x93   : > { %5416 = vmatprep.subr.bf16.mxu0 %v5636_v48 }
  0x94   : > { %5375 = vmatpush3.bf16.msra.mxu1 %v5641_v25  ;;  %v2000_v25 = vrot.slane %v1998_v62, 2  ;;  %v1600_v37 = vsel %vm1115_vm2, %v1597_v56, %v1599_v63  ;;  %v6287_v38 = vsel %vm3677_vm5, %v3678_v41, %v3679_v31  ;;  %v2018_v62 = vrot.slane %v2016_v9, 2  ;;  %v6334_v9 = vld [vmem:[%s5761_s30 + $0x40] sm:$0xff]  }
  0x95   : > { %5337 = vmatmul.mubr.msk.bf16.gmra.mxu0 %vm634_vm1, %v1966_v60  ;;  %5456 = vmatprep.subr.bf16.mxu1 %v6242_v36  ;;  %v2024_v56 = vrot.slane %v2022_v51, 1  ;;  %v2043_v41 = vshll.u32 %v6137_v57, 16 }
  0x96   : > { %5340 = vmatprep.mubr.msk.bf16.mxu0 %vm634_vm1, %v1975_v43  ;;  %5417 = vmatpush3.bf16.msra.mxu0 %v5636_v48  ;;  %v3681_v48 = vrot.slane %v6277_v27, 3  ;;  %v2001_v60 = vor.u32 %v2000_v25, %v1997_v13  ;;  %v2010_v43 = vor.u32 %v2009_v20, %v2006_v32  ;;  %v2019_v13 = vor.u32 %v2018_v62, %v2015_v59 }
  0x97   : > { %5297 = vmatmul.mubr.msk.bf16.gmra.mxu1 %vm634_vm1, %v1594_v19  ;;  %5418 = vmatprep.subr.bf16.mxu0 %v5642_v10  ;;  %v1603_v19 = vrot.slane %v6112_v47, 1  ;;  %v2031_v25 = vshrl.u32 %v6116_v50, 16  ;;  %v2034_v32 = vshll.u32 %v6116_v50, 16  ;;  %v2040_v20 = vshrl.u32 %v6137_v57, 16 }
  0x98   : > { %5300 = vmatprep.mubr.msk.bf16.mxu1 %vm634_vm1, %v1596_v52  ;;  %v6293_v49 = vsel %vm3677_vm5, %v3679_v31, %v3681_v48  ;;  %v6302_v52 = vld [vmem:[%s5761_s30 + $0x28] sm:$0xff]   ;;  %v2002_v44 = vsel %vm1922_vm4, %v1992_v55, %v2001_v60  ;;  %v2011_v3 = vsel %vm1922_vm4, %v2001_v60, %v2010_v43  ;;  %v1605_v31 = vrot.slane %v6116_v50, 1 }
  0x99   : > { %v3683_v18 = vrot.slane %v6302_v52, 3  ;;  %v2033_v60 = vrot.slane %v2031_v25, 1  ;;  %v2036_v61 = vrot.slane %v2034_v32, 2  ;;  %v2042_v29 = vrot.slane %v2040_v20, 1 }
  0x9a   : > { %5419 = vmatpush3.bf16.msra.mxu0 %v5642_v10  ;;  %v1601_v10 = vrot.slane %v6086_v33, 1  ;;  %v3685_v33 = vrot.slane %v6306_v1, 3  ;;  %v1606_v59 = vsel %vm1115_vm2, %v1603_v19, %v1605_v31  ;;  %v7279_v50 = vrot.slane %v6334_v9, 3 }
  0x9b   : > { %5500 = vmatprep.subr.bf16.mxu0 %v6262_v8  ;;  %v6315_v55 = vsel %vm3677_vm5, %v3681_v48, %v3683_v18  ;;  %v6330_v48 = vld [vmem:[%s5761_s30 + $0x38] sm:$0xff]   ;;  %v2037_v62 = vor.u32 %v2036_v61, %v2033_v60 }
  0x9c   : > { %v1604_v47 = vsel %vm1115_vm2, %v1601_v10, %v1603_v19 }
  0x9d   : > { %5341 = vmatmul.mubr.msk.bf16.gmra.mxu0 %vm634_vm1, %v1984_v22  ;;  %v1602_v22 = vsel %vm1115_vm2, %v1599_v63, %v1601_v10  ;;  %v6321_v63 = vsel %vm3677_vm5, %v3683_v18, %v3685_v33  ;;  %v2045_v10 = vrot.slane %v2043_v41, 2  ;;  %v2058_v18 = vshrl.u32 %v6167_v39, 16 }
  0x9e   : > { %5344 = vmatprep.mubr.msk.bf16.mxu0 %vm634_vm1, %v1993_v7  ;;  %v2028_v7 = vor.u32 %v2027_v5, %v2024_v56  ;;  %v2052_v56 = vshll.u32 %v6144_v12, 16 }
  0x9f   : > { %5301 = vmatmul.mubr.msk.bf16.gmra.mxu1 %vm634_vm1, %v1598_v28  ;;  %v1607_v28 = vrot.slane %v6137_v57, 1  ;;  %v2046_v5 = vor.u32 %v2045_v10, %v2042_v29  ;;  %v2060_v41 = vrot.slane %v2058_v18, 1  ;;  %v2079_v29 = vshll.u32 %v6202_v0, 16 }
  0xa0   : > { %5304 = vmatprep.mubr.msk.bf16.mxu1 %vm634_vm1, %v1600_v37  ;;  %v2020_v37 = vsel %vm1922_vm4, %v2010_v43, %v2019_v13  ;;  %v2029_v51 = vsel %vm1922_vm4, %v2019_v13, %v2028_v7  ;;  %v2038_v13 = vsel %vm1922_vm4, %v2028_v7, %v2037_v62  ;;  %v2054_v32 = vrot.slane %v2052_v56, 2 }
  0xa1   : > { %v1608_v57 = vsel %vm1115_vm2, %v1605_v31, %v1607_v28  ;;  %v2047_v20 = vsel %vm1922_vm4, %v2037_v62, %v2046_v5  ;;  %v1615_v10 = vrot.slane %v6202_v0, 1  ;;  %v2081_v56 = vrot.slane %v2079_v29, 2 }
  0xa2   : > { %v2868_v29 = vrot.slane %v6302_v52, 2 }
  0xa5   : > { %5345 = vmatmul.mubr.msk.bf16.gmra.mxu0 %vm634_vm1, %v2002_v44  ;;  %v3687_v44 = vrot.slane %v6330_v48, 3 }
  0xa6   : > { %5348 = vmatprep.mubr.msk.bf16.mxu0 %vm634_vm1, %v2011_v3  ;;  %v2049_v3 = vshrl.u32 %v6144_v12, 16 }
  0xa7   : > { %5305 = vmatmul.mubr.msk.bf16.gmra.mxu1 %vm634_vm1, %v1602_v22  ;;  %v6343_v43 = vsel %vm3677_vm5, %v3685_v33, %v3687_v44  ;;  %v6351_v19 = vsel %vm3677_vm5, %v3687_v44, %v7279_v50  ;;  %v2061_v22 = vshll.u32 %v6167_v39, 16  ;;  %v1609_v33 = vrot.slane %v6144_v12, 1  ;;  %v6567_v50 = vld [vmem:[%s5761_s30 + $0x88] sm:$0xff]  }
  0xa8   : > { %5308 = vmatprep.mubr.msk.bf16.mxu1 %vm634_vm1, %v1604_v47  ;;  %v1611_v47 = vrot.slane %v6167_v39, 1  ;;  %v2051_v25 = vrot.slane %v2049_v3, 1  ;;  %v2067_v12 = vshrl.u32 %v6170_v40, 16  ;;  %v2070_v39 = vshll.u32 %v6170_v40, 16  ;;  %7300 = vst [vmem:[#allocation16_spill] sm:$0xff] %v6567_v50 }
  0xa9   : > { %v2063_v31 = vrot.slane %v2061_v22, 2  ;;  %v5644_v22 = vld [vmem:[%s5761_s30 + $0x98] ss:$0 sps:$4 sm:$0x11]  }
  0xaa   : > { %v1612_v60 = vsel %vm1115_vm2, %v1609_v33, %v1611_v47  ;;  %v2055_v61 = vor.u32 %v2054_v32, %v2051_v25  ;;  %v1617_v25 = vrot.slane %v5644_v22, 1  ;;  %v2725_v32 = vld [vmem:[%s5761_s30 + $0x10] sm:$0xc] }
  0xab   : > { %v2064_v7 = vor.u32 %v2063_v31, %v2060_v41 }
  0xac   : > { %v2056_v44 = vsel %vm1922_vm4, %v2046_v5, %v2055_v61  ;;  %v2088_v5 = vshll.u32 %v6206_v11, 16 }
  0xad   : > { %5349 = vmatmul.mubr.msk.bf16.gmra.mxu0 %vm634_vm1, %v2020_v37  ;;  %v1610_v37 = vsel %vm1115_vm2, %v1607_v28, %v1609_v33  ;;  %v1613_v28 = vrot.slane %v6170_v40, 1  ;;  %v2065_v62 = vsel %vm1922_vm4, %v2055_v61, %v2064_v7 }
  0xae   : > { %5352 = vmatprep.mubr.msk.bf16.mxu0 %vm634_vm1, %v2029_v51  ;;  %v2076_v51 = vshrl.u32 %v6202_v0, 16  ;;  %v2085_v0 = vshrl.u32 %v6206_v11, 16  ;;  %v2090_v41 = vrot.slane %v2088_v5, 2  ;;  %v6463_v5 = vld [vmem:[%s5761_s30 + $0x50] sm:$0xff]  }
  0xaf   : > { %5309 = vmatmul.mubr.msk.bf16.gmra.mxu1 %vm634_vm1, %v1606_v59  ;;  %v2069_v59 = vrot.slane %v2067_v12, 1  ;;  %v1614_v18 = vsel %vm1115_vm2, %v1611_v47, %v1613_v28  ;;  %v1616_v33 = vsel %vm1115_vm2, %v1613_v28, %v1615_v10  ;;  %v2864_v12 = vrot.slane %v6272_v2, 2 }
  0xb0   : > { %5312 = vmatprep.mubr.msk.bf16.mxu1 %vm634_vm1, %v1608_v57  ;;  %v2072_v57 = vrot.slane %v2070_v39, 2  ;;  %v2078_v3 = vrot.slane %v2076_v51, 1  ;;  %v2866_v51 = vrot.slane %v6277_v27, 2 }
  0xb2   : > { %v2073_v40 = vor.u32 %v2072_v57, %v2069_v59  ;;  %v2867_v28 = vsel %vm2396_vm3, %v2864_v12, %v2866_v51  ;;  %v5663_v59 = vld [vmem:[%s7275_s1 + $0x108] sm:$0xff]  }
  0xb4   : > { %v2074_v47 = vsel %vm1922_vm4, %v2064_v7, %v2073_v40  ;;  %v5656_v7 = vld [vmem:[%s7275_s1 + $0xf0] sm:$0xff]  }
  0xb5   : > { %5353 = vmatmul.mubr.msk.bf16.gmra.mxu0 %vm634_vm1, %v2038_v13  ;;  %v2082_v13 = vor.u32 %v2081_v56, %v2078_v3 }
  0xb6   : > { %5356 = vmatprep.mubr.msk.bf16.mxu0 %vm634_vm1, %v2047_v20  ;;  %v2087_v20 = vrot.slane %v2085_v0, 1 }
  0xb7   : > { %5313 = vmatmul.mubr.msk.bf16.gmra.mxu1 %vm634_vm1, %v1610_v37  ;;  %v2083_v31 = vsel %vm1922_vm4, %v2073_v40, %v2082_v13  ;;  %v6388_v37 = vcombine.low %v2725_v32, %v6267_v42  ;;  %v6471_v32 = vld [vmem:[%s5761_s30 + $0x58] sm:$0xff]  }
  0xb8   : > { %5316 = vmatprep.mubr.msk.bf16.mxu1 %vm634_vm1, %v1612_v60  ;;  %v1618_v60 = vsel %vm1115_vm2, %v1615_v10, %v1617_v25  ;;  %v2091_v11 = vor.u32 %v2090_v41, %v2087_v20  ;;  %v2869_v10 = vsel %vm2396_vm3, %v2866_v51, %v2868_v29  ;;  %v2878_v20 = vrot.slane %v6463_v5, 2  ;;  %v6503_v51 = vld [vmem:[%s5761_s30 + $0x68] sm:$0xff]  }
  0xb9   : > { %v2863_v61 = vrot.slane %v6388_v37, 2 }
  0xba   : > { %v2092_v39 = vsel %vm1922_vm4, %v2082_v13, %v2091_v11 }
  0xbb   : > { %v2865_v42 = vsel %vm2396_vm3, %v2863_v61, %v2864_v12 }
  0xbd   : > { %5357 = vmatmul.mubr.msk.bf16.gmra.mxu0 %vm634_vm1, %v2056_v44  ;;  %v2872_v44 = vrot.slane %v6330_v48, 2 }
  0xbe   : > { %5360 = vmatprep.mubr.msk.bf16.mxu0 %vm634_vm1, %v2065_v62  ;;  %v6438_v62 = vld [vmem:[%s5761_s30 + $0x48] sm:$0xff]  }
  0xbf   : > { %5317 = vmatmul.mubr.msk.bf16.gmra.mxu1 %vm634_vm1, %v1614_v18  ;;  %v2876_v22 = vrot.slane %v6438_v62, 2 }
  0xc0   : > { %5320 = vmatprep.mubr.msk.bf16.mxu1 %vm634_vm1, %v1616_v33 }
  0xc1   : > { %v2879_v12 = vsel %vm2396_vm3, %v2876_v22, %v2878_v20 }
  0xc5   : > { %5361 = vmatmul.mubr.msk.bf16.gmra.mxu0 %vm634_vm1, %v2074_v47 }
  0xc6   : > { %5364 = vmatprep.mubr.msk.bf16.mxu0 %vm634_vm1, %v2083_v31 }
  0xc7   : > { %5321 = vmatmul.mubr.msk.bf16.gmra.mxu1 %vm634_vm1, %v1618_v60  ;;  %v2880_v60 = vrot.slane %v6471_v32, 2 }
  0xc8   : > { %5376 = vmatprep.mubr.msk.bf16.mxu1 %vm634_vm1, %v6041_v4  ;;  %v5662_v4 = vld [vmem:[%s7275_s1 + $0xe8] sm:$0xff]  }
  0xcd   : > { %5365 = vmatmul.mubr.msk.bf16.gmra.mxu0 %vm634_vm1, %v2092_v39  ;;  %v6495_v39 = vld [vmem:[%s5761_s30 + $0x60] sm:$0xff]  }
  0xce   : > { %5420 = vmatprep.mubr.msk.bf16.mxu0 %vm634_vm1, %v2865_v42 }
  0xcf   : > { %5377 = vmatmul.mubr.msk.bf16.vlgmr.msra.gmra.mxu1 %vm634_vm1, %v6049_v14  ;;  %v5657_v14 = vld [vmem:[%s7275_s1 + $0x110] sm:$0xff]  }
  0xd0   : > { %5380 = vmatprep.mubr.msk.bf16.mxu1 %vm634_vm1, %v6052_v15  ;;  %5457 = vmatpush3.bf16.msra.mxu1 %v6242_v36  ;;  %v5668_v15 = vld [vmem:[%s7275_s1 + $0xe0] sm:$0xff]   ;;  %v2870_v36 = vrot.slane %v6306_v1, 2 }
  0xd1   : > { %5458 = vmatprep.subr.bf16.mxu1 %v5656_v7 }
  0xd2   : > { %v2873_v57 = vsel %vm2396_vm3, %v2870_v36, %v2872_v44 }
  0xd4   : > { %5459 = vmatpush3.bf16.msra.mxu1 %v5656_v7 }
  0xd5   : > { %5421 = vmatmul.mubr.msk.bf16.vlgmr.msra.gmra.mxu0 %vm634_vm1, %v2867_v28  ;;  %5460 = vmatprep.subr.bf16.mxu1 %v5662_v4 }
  0xd6   : > { %5501 = vmatpush3.bf16.msra.mxu0 %v6262_v8  ;;  %5424 = vmatprep.mubr.msk.bf16.mxu0 %vm634_vm1, %v2869_v10  ;;  %v2871_v8 = vsel %vm2396_vm3, %v2868_v29, %v2870_v36 }
  0xd7   : > { %5381 = vmatmul.mubr.msk.bf16.gmra.mxu1 %vm634_vm1, %v6069_v23  ;;  %5502 = vmatprep.subr.bf16.mxu0 %v5657_v14  ;;  %v5669_v23 = vld [vmem:[%s7275_s1 + $0x100] sm:$0xff]  }
  0xd8   : > { %5384 = vmatprep.mubr.msk.bf16.mxu1 %vm634_vm1, %v6074_v26  ;;  %5461 = vmatpush3.bf16.msra.mxu1 %v5662_v4  ;;  %v2874_v26 = vrot.slane %v6334_v9, 2  ;;  %v2882_v4 = vrot.slane %v6495_v39, 2 }
  0xd9   : > { %5462 = vmatprep.subr.bf16.mxu1 %v5668_v15 }
  0xda   : > { %5503 = vmatpush3.bf16.msra.mxu0 %v5657_v14  ;;  %v2875_v0 = vsel %vm2396_vm3, %v2872_v44, %v2874_v26  ;;  %v2877_v25 = vsel %vm2396_vm3, %v2874_v26, %v2876_v22  ;;  %v2884_v14 = vrot.slane %v6503_v51, 2  ;;  %v2883_v44 = vsel %vm2396_vm3, %v2880_v60, %v2882_v4 }
  0xdb   : > { %5504 = vmatprep.subr.bf16.mxu0 %v5663_v59 }
  0xdc   : > { %5463 = vmatpush3.bf16.msra.mxu1 %v5668_v15 }
  0xdd   : > { %v6443_v3 = vpop.f32.mrf.mxu0  ;;  %5425 = vmatmul.mubr.msk.bf16.gmra.mxu0 %vm634_vm1, %v2871_v8  ;;  %v6448_v56 = vpop.f32.mrf.mxu1 }
  0xde   : > { %5428 = vmatprep.mubr.msk.bf16.mxu0 %vm634_vm1, %v2873_v57  ;;  %5505 = vmatpush3.bf16.msra.mxu0 %v5663_v59  ;;  %v6527_v59 = vld [vmem:[%s5761_s30 + $0x70] sm:$0xff]  }
  0xdf   : > { %5385 = vmatmul.mubr.msk.bf16.gmra.mxu1 %vm634_vm1, %v6077_v30  ;;  %v6452_v18 = vpop.f32.mrf.mxu0  ;;  %5506 = vmatprep.subr.bf16.mxu0 %v5669_v23  ;;  %v6457_v33 = vpop.f32.mrf.mxu1  ;;  %v2886_v22 = vrot.slane %v6527_v59, 2 }
  0xe0   : > { %5388 = vmatprep.mubr.msk.bf16.mxu1 %vm634_vm1, %v6090_v34 }
  0xe1   : > { %v6459_v40 = vpop.f32.mrf.mxu0  ;;  %v6465_v13 = vpop.f32.mrf.mxu1 }
  0xe2   : > { %5507 = vmatpush3.bf16.msra.mxu0 %v5669_v23  ;;  %v6535_v23 = vld [vmem:[%s5761_s30 + $0x78] sm:$0xff]  }
  0xe3   : > { %v6467_v30 = vpop.f32.mrf.mxu0  ;;  %v6473_v47 = vpop.f32.mrf.mxu1  ;;  %7294 = vst [vmem:[#allocation10_spill] sm:$0xff] %v6535_v23 }
  0xe4   : > { %7286 = vst [vmem:[#allocation2_spill] sm:$0xff] %v6473_v47 }
  0xe5   : > { %v6475_v34 = vpop.f32.mrf.mxu0  ;;  %5429 = vmatmul.mubr.msk.bf16.gmra.mxu0 %vm634_vm1, %v2875_v0  ;;  %v6480_v41 = vpop.f32.mrf.mxu1 }
  0xe6   : > { %5432 = vmatprep.mubr.msk.bf16.mxu0 %vm634_vm1, %v2877_v25  ;;  %7287 = vst [vmem:[#allocation3_spill] sm:$0xff] %v6480_v41 }
  0xe7   : > { %5389 = vmatmul.mubr.msk.bf16.gmra.mxu1 %vm634_vm1, %v6093_v35  ;;  %v6484_v31 = vpop.f32.mrf.mxu0  ;;  %v6489_v11 = vpop.f32.mrf.mxu1  ;;  %v2881_v35 = vsel %vm2396_vm3, %v2878_v20, %v2880_v60  ;;  %v2888_v20 = vrot.slane %v6535_v23, 2 }
  0xe8   : > { %5392 = vmatprep.mubr.msk.bf16.mxu1 %vm634_vm1, %v6103_v45  ;;  %7288 = vst [vmem:[#allocation4_spill] sm:$0xff] %v6489_v11 }
  0xe9   : > { %v6491_v61 = vpop.f32.mrf.mxu0  ;;  %v6497_v42 = vpop.f32.mrf.mxu1 }
  0xea   : > { %7289 = vst [vmem:[#allocation5_spill] sm:$0xff] %v6497_v42 }
  0xeb   : > { %v6499_v7 = vpop.f32.mrf.mxu0  ;;  %v6505_v29 = vpop.f32.mrf.mxu1 }
  0xec   : > { %7290 = vst [vmem:[#allocation6_spill] sm:$0xff] %v6505_v29 }
  0xed   : > { %v6507_v45 = vpop.f32.mrf.mxu0  ;;  %5433 = vmatmul.mubr.msk.bf16.gmra.mxu0 %vm634_vm1, %v2879_v12  ;;  %v6512_v28 = vpop.f32.mrf.mxu1 }
  0xee   : > { %5436 = vmatprep.mubr.msk.bf16.mxu0 %vm634_vm1, %v2881_v35  ;;  %7291 = vst [vmem:[#allocation7_spill] sm:$0xff] %v6512_v28  ;;  %v2887_v35 = vsel %vm2396_vm3, %v2884_v14, %v2886_v22 }
  0xef   : > { %5393 = vmatmul.mubr.msk.bf16.gmra.mxu1 %vm634_vm1, %v6109_v46  ;;  %v6516_v10 = vpop.f32.mrf.mxu0  ;;  %v6521_v15 = vpop.f32.mrf.mxu1  ;;  %v2885_v46 = vsel %vm2396_vm3, %v2882_v4, %v2884_v14  ;;  %v6559_v4 = vld [vmem:[%s5761_s30 + $0x80] sm:$0xff]  }
  0xf0   : > { %5396 = vmatprep.mubr.msk.bf16.mxu1 %vm634_vm1, %v6125_v53  ;;  %7292 = vst [vmem:[#allocation8_spill] sm:$0xff] %v6521_v15  ;;  %7298 = vst [vmem:[#allocation14_spill] sm:$0xff] %v6559_v4  ;;  %v3213_v15 = vshrl.u32 %v6272_v2, 16 }
  0xf1   : > { %v6523_v36 = vpop.f32.mrf.mxu0  ;;  %v6529_v8 = vpop.f32.mrf.mxu1 }
  0xf2   : > { %7293 = vst [vmem:[#allocation9_spill] sm:$0xff] %v6529_v8  ;;  %v3208_v8 = vshll.u32 %v6388_v37, 16 }
  0xf3   : > { %v6531_v57 = vpop.f32.mrf.mxu0  ;;  %v6537_v26 = vpop.f32.mrf.mxu1 }
  0xf4   : > { %7295 = vst [vmem:[#allocation11_spill] sm:$0xff] %v6537_v26  ;;  %v3210_v41 = vrot.slane %v3208_v8, 3 }
  0xf5   : > { %v6539_v53 = vpop.f32.mrf.mxu0  ;;  %5437 = vmatmul.mubr.msk.bf16.gmra.mxu0 %vm634_vm1, %v2883_v44  ;;  %v6544_v0 = vpop.f32.mrf.mxu1 }
  0xf6   : > { %5440 = vmatprep.mubr.msk.bf16.mxu0 %vm634_vm1, %v2885_v46  ;;  %7296 = vst [vmem:[#allocation12_spill] sm:$0xff] %v6544_v0 }
  0xf7   : > { %5397 = vmatmul.mubr.msk.bf16.gmra.mxu1 %vm634_vm1, %v6129_v54  ;;  %v6548_v25 = vpop.f32.mrf.mxu0  ;;  %v6553_v60 = vpop.f32.mrf.mxu1  ;;  %v2889_v54 = vsel %vm2396_vm3, %v2886_v22, %v2888_v20  ;;  %v2892_v22 = vrot.slane %v6567_v50, 2  ;;  %v6593_v50 = vld [vmem:[%s5761_s30 + $0x90] sm:$0xff]  }
  0xf8   : > { %5400 = vmatprep.mubr.msk.bf16.mxu1 %vm634_vm1, %v6151_v17  ;;  %7297 = vst [vmem:[#allocation13_spill] sm:$0xff] %v6553_v60  ;;  %v2890_v17 = vrot.slane %v6559_v4, 2  ;;  %v6599_v4 = vld [vmem:[%s5761_s30 + $0x98] sm:$0xff]  }
  0xf9   : > { %v6555_v12 = vpop.f32.mrf.mxu0  ;;  %v6561_v44 = vpop.f32.mrf.mxu1 }
  0xfa   : > { %7299 = vst [vmem:[#allocation15_spill] sm:$0xff] %v6561_v44  ;;  %v2891_v29 = vsel %vm2396_vm3, %v2888_v20, %v2890_v17 }
  0xfb   : > { %v6563_v46 = vpop.f32.mrf.mxu0  ;;  %v6569_v0 = vpop.f32.mrf.mxu1 }
  0xfc   : > { %7301 = vst [vmem:[#allocation17_spill] sm:$0xff] %v6569_v0 }
  0xfd   : > { %v6571_v26 = vpop.f32.mrf.mxu0  ;;  %5441 = vmatmul.mubr.msk.bf16.gmra.mxu0 %vm634_vm1, %v2887_v35  ;;  %v5202_v14 = vpop.f32.mrf.mxu1 }
  0xfe   : > { %5444 = vmatprep.mubr.msk.bf16.mxu0 %vm634_vm1, %v2889_v54  ;;  %v969_v0 = vadd.f32 %v5202_v14, %v6443_v3  ;;  %v3205_v54 = vshrl.u32 %v6388_v37, 16 }
  0xff   : > { %5401 = vmatmul.mubr.msk.bf16.gmra.mxu1 %vm634_vm1, %v6157_v21  ;;  %v6578_v44 = vpop.f32.mrf.mxu0  ;;  %v960_v35 = vpop.f32.mrf.mxu1  ;;  %v3216_v21 = vshll.u32 %v6272_v2, 16 }
 0x100   : > { %5404 = vmatprep.mubr.msk.bf16.mxu1 %vm634_vm1, %v6183_v58  ;;  %v961_v28 = vadd.f32 %v960_v35, %v6452_v18  ;;  %v2893_v58 = vsel %vm2396_vm3, %v2890_v17, %v2892_v22  ;;  %v3207_v2 = vrot.slane %v3205_v54, 2  ;;  %v3215_v18 = vrot.slane %v3213_v15, 2 }
 0x101   : > { %v6584_v60 = vpop.f32.mrf.mxu0  ;;  %v5203_v3 = vpop.f32.mrf.mxu1  ;;  %v3218_v35 = vrot.slane %v3216_v21, 3  ;;  %v2894_v17 = vrot.slane %v6593_v50, 2 }
 0x102   : > { %v972_v42 = vadd.f32 %v5203_v3, %v6459_v40  ;;  %v2896_v3 = vrot.slane %v6599_v4, 2  ;;  %v3211_v54 = vor.u32 %v3210_v41, %v3207_v2 }
 0x103   : > { %v6595_v14 = vpop.f32.mrf.mxu0  ;;  %v963_v37 = vpop.f32.mrf.mxu1  ;;  %v3219_v21 = vor.u32 %v3218_v35, %v3215_v18 }
 0x104   : > { %v964_v20 = vadd.f32 %v963_v37, %v6467_v30  ;;  %v3222_v30 = vshrl.u32 %v6277_v27, 16 }
 0x105   : > { %v5246_v11 = vpop.f32.mrf.mxu0  ;;  %5445 = vmatmul.mubr.msk.bf16.gmra.mxu0 %vm634_vm1, %v2891_v29  ;;  %v5206_v23 = vpop.f32.mrf.mxu1 }
 0x106   : > { %v6604_v47 = vadd.f32 %v5246_v11, %v969_v0  ;;  %5448 = vmatprep.mubr.msk.bf16.mxu0 %vm634_vm1, %v2893_v58  ;;  %v985_v29 = vadd.f32 %v5206_v23, %v6475_v34  ;;  %v3225_v11 = vshll.u32 %v6277_v27, 16  ;;  %v3234_v58 = vshll.u32 %v6302_v52, 16 }
 0x107   : > { %5405 = vmatmul.mubr.msk.bf16.gmra.mxu1 %vm634_vm1, %v6189_v6  ;;  %v1265_v40 = vpop.f32.mrf.mxu0  ;;  %v976_v8 = vpop.f32.mrf.mxu1  ;;  %v3231_v6 = vshrl.u32 %v6302_v52, 16  ;;  %v2897_v27 = vsel %vm2396_vm3, %v2894_v17, %v2896_v3  ;;  %v3224_v2 = vrot.slane %v3222_v30, 2  ;;  %v3240_v30 = vshrl.u32 %v6306_v1, 16 }
 0x108   : > { %v6612_v15 = vadd.f32 %v1265_v40, %v961_v28  ;;  %5408 = vmatprep.mubr.msk.bf16.mxu1 %vm634_vm1, %v6221_v24  ;;  %v977_v37 = vadd.f32 %v976_v8, %v6484_v31  ;;  %v2895_v28 = vsel %vm2396_vm3, %v2892_v22, %v2894_v17  ;;  %v5673_v24 = vld [vmem:[%s5761_s30 + $0xa0] ss:$0 sps:$4 sm:$0x33]   ;;  %v3227_v18 = vrot.slane %v3225_v11, 3 }
 0x109   : > { %v5247_v0 = vpop.f32.mrf.mxu0  ;;  %v5207_v23 = vpop.f32.mrf.mxu1  ;;  %v3220_v31 = vsel %vm3203_vm6, %v3211_v54, %v3219_v21  ;;  %v3236_v22 = vrot.slane %v3234_v58, 3  ;;  %v2898_v17 = vrot.slane %v5673_v24, 2  ;;  %v3243_v11 = vshll.u32 %v6306_v1, 16 }
 0x10a   : > { %7302 = vst [vmem:[#allocation18_spill] sm:$0xff] %v6612_v15  ;;  %v6621_v34 = vadd.f32 %v5247_v0, %v972_v42  ;;  %v988_v15 = vadd.f32 %v5207_v23, %v6491_v61  ;;  %v3233_v42 = vrot.slane %v3231_v6, 2  ;;  %v3249_v24 = vshrl.u32 %v6330_v48, 16 }
 0x10b   : > { %v1268_v40 = vpop.f32.mrf.mxu0  ;;  %v979_v35 = vpop.f32.mrf.mxu1  ;;  %v3252_v23 = vshll.u32 %v6330_v48, 16  ;;  %v2899_v1 = vsel %vm2396_vm3, %v2896_v3, %v2898_v17 }
 0x10c   : > { %v6627_v41 = vadd.f32 %v1268_v40, %v964_v20  ;;  %v980_v8 = vadd.f32 %v979_v35, %v6499_v7  ;;  %v3228_v7 = vor.u32 %v3227_v18, %v3224_v2  ;;  %v3245_v35 = vrot.slane %v3243_v11, 3 }
 0x10d   : > { %v5250_v52 = vpop.f32.mrf.mxu0  ;;  %5449 = vmatmul.mubr.msk.bf16.gmra.mxu0 %vm634_vm1, %v2895_v28  ;;  %v3237_v28 = vor.u32 %v3236_v22, %v3233_v42 }
 0x10e   : > { %v6632_v0 = vadd.f32 %v5250_v52, %v985_v29  ;;  %5452 = vmatprep.mubr.msk.bf16.mxu0 %vm634_vm1, %v2897_v27  ;;  %v3229_v18 = vsel %vm3203_vm6, %v3219_v21, %v3228_v7 }
 0x10f   : > { %v5210_v61 = vpop.f32.mrf.mxu1  ;;  %5409 = vmatmul.mubr.msk.bf16.gmra.mxu1 %vm634_vm1, %v6228_v16  ;;  %v1281_v20 = vpop.f32.mrf.mxu0  ;;  %v3238_v48 = vsel %vm3203_vm6, %v3228_v7, %v3237_v28  ;;  %v3270_v7 = vshll.u32 %v6438_v62, 16 }
 0x110   : > { %v1001_v54 = vadd.f32 %v5210_v61, %v6507_v45  ;;  %v6640_v6 = vadd.f32 %v1281_v20, %v977_v37  ;;  %5464 = vmatprep.mubr.msk.bf16.mxu1 %vm634_vm1, %v3220_v31  ;;  %v3242_v37 = vrot.slane %v3240_v30, 2  ;;  %v3258_v20 = vshrl.u32 %v6334_v9, 16 }
 0x111   : > { %v992_v29 = vpop.f32.mrf.mxu1  ;;  %v5251_v58 = vpop.f32.mrf.mxu0 }
 0x112   : > { %v993_v16 = vadd.f32 %v992_v29, %v6516_v10  ;;  %v6646_v40 = vadd.f32 %v5251_v58, %v988_v15  ;;  %v3251_v10 = vrot.slane %v3249_v24, 2  ;;  %v3254_v15 = vrot.slane %v3252_v23, 3 }
 0x113   : > { %v5211_v27 = vpop.f32.mrf.mxu1  ;;  %v1284_v45 = vpop.f32.mrf.mxu0  ;;  %v3246_v21 = vor.u32 %v3245_v35, %v3242_v37 }
 0x114   : > { %v1004_v52 = vadd.f32 %v5211_v27, %v6523_v36  ;;  %v6650_v2 = vadd.f32 %v1284_v45, %v980_v8  ;;  %v3260_v27 = vrot.slane %v3258_v20, 2 }
 0x115   : > { %v995_v31 = vpop.f32.mrf.mxu1  ;;  %v5254_v42 = vpop.f32.mrf.mxu0  ;;  %5453 = vmatmul.mubr.msk.bf16.gmra.mxu0 %vm634_vm1, %v2899_v1  ;;  %v3247_v23 = vsel %vm3203_vm6, %v3237_v28, %v3246_v21 }
 0x116   : > { %v996_v3 = vadd.f32 %v995_v31, %v6531_v57  ;;  %v6656_v22 = vadd.f32 %v5254_v42, %v1001_v54  ;;  %5508 = vmatprep.mubr.msk.bf16.mxu0 %vm634_vm1, %v6287_v38  ;;  %v3261_v57 = vshll.u32 %v6334_v9, 16  ;;  %v3255_v54 = vor.u32 %v3254_v15, %v3251_v10 }
 0x117   : > { %v5214_v36 = vpop.f32.mrf.mxu1  ;;  %5465 = vmatmul.mubr.msk.bf16.vlgmr.msra.gmra.mxu1 %vm634_vm1, %v3229_v18  ;;  %v1297_v8 = vpop.f32.mrf.mxu0  ;;  %v3267_v38 = vshrl.u32 %v6438_v62, 16  ;;  %v3279_v10 = vshll.u32 %v6463_v5, 16 }
 0x118   : > { %v1017_v17 = vadd.f32 %v5214_v36, %v6539_v53  ;;  %v6662_v61 = vadd.f32 %v1297_v8, %v993_v16  ;;  %5468 = vmatprep.mubr.msk.bf16.mxu1 %vm634_vm1, %v3238_v48  ;;  %v3263_v45 = vrot.slane %v3261_v57, 3  ;;  %v3256_v18 = vsel %vm3203_vm6, %v3246_v21, %v3255_v54 }
 0x119   : > { %v1008_v30 = vpop.f32.mrf.mxu1  ;;  %v5255_v11 = vpop.f32.mrf.mxu0  ;;  %v3276_v48 = vshrl.u32 %v6463_v5, 16  ;;  %v3288_v21 = vshll.u32 %v6471_v32, 16 }
 0x11a   : > { %v1009_v29 = vadd.f32 %v1008_v30, %v6548_v25  ;;  %v6670_v58 = vadd.f32 %v5255_v11, %v1004_v52  ;;  %v3269_v25 = vrot.slane %v3267_v38, 2  ;;  %v3272_v52 = vrot.slane %v3270_v7, 3 }
 0x11b   : > { %v5215_v53 = vpop.f32.mrf.mxu1  ;;  %v1300_v24 = vpop.f32.mrf.mxu0  ;;  %v3278_v11 = vrot.slane %v3276_v48, 2 }
 0x11c   : > { %v1020_v16 = vadd.f32 %v5215_v53, %v6555_v12  ;;  %v6674_v1 = vadd.f32 %v1300_v24, %v996_v3  ;;  %v3273_v8 = vor.u32 %v3272_v52, %v3269_v25 }
 0x11d   : > { %v1011_v37 = vpop.f32.mrf.mxu1  ;;  %v5258_v35 = vpop.f32.mrf.mxu0  ;;  %5509 = vmatmul.mubr.msk.bf16.vlgmr.msra.gmra.mxu0 %vm634_vm1, %v6293_v49 }
 0x11e   : > { %v1012_v31 = vadd.f32 %v1011_v37, %v6563_v46  ;;  %v6680_v42 = vadd.f32 %v5258_v35, %v1017_v17  ;;  %5512 = vmatprep.mubr.msk.bf16.mxu0 %vm634_vm1, %v6315_v55  ;;  %v3264_v46 = vor.u32 %v3263_v45, %v3260_v27  ;;  %v3285_v55 = vshrl.u32 %v6471_v32, 16 }
 0x11f   : > { %v5218_v12 = vpop.f32.mrf.mxu1  ;;  %5469 = vmatmul.mubr.msk.bf16.gmra.mxu1 %vm634_vm1, %v3247_v23  ;;  %v1313_v28 = vpop.f32.mrf.mxu0  ;;  %v3691_v35 = vrot.slane %v6438_v62, 3 }
 0x120   : > { %v1033_v49 = vadd.f32 %v5218_v12, %v6571_v26  ;;  %v6688_v15 = vadd.f32 %v1313_v28, %v1009_v29  ;;  %5472 = vmatprep.mubr.msk.bf16.mxu1 %vm634_vm1, %v3256_v18  ;;  %v3281_v26 = vrot.slane %v3279_v10, 3  ;;  %v3265_v29 = vsel %vm3203_vm6, %v3255_v54, %v3264_v46 }
 0x121   : > { %v1024_v3 = vpop.f32.mrf.mxu1  ;;  %v5259_v36 = vpop.f32.mrf.mxu0  ;;  %v3274_v23 = vsel %vm3203_vm6, %v3264_v46, %v3273_v8  ;;  %v3306_v12 = vshll.u32 %v6503_v51, 16 }
 0x122   : > { %v1025_v17 = vadd.f32 %v1024_v3, %v6578_v44  ;;  %v6694_v20 = vadd.f32 %v5259_v36, %v1020_v16  ;;  %v3287_v44 = vrot.slane %v3285_v55, 2  ;;  %v3290_v16 = vrot.slane %v3288_v21, 3 }
 0x123   : > { %v5219_v57 = vpop.f32.mrf.mxu1  ;;  %v1316_v30 = vpop.f32.mrf.mxu0  ;;  %v3282_v37 = vor.u32 %v3281_v26, %v3278_v11  ;;  %v3308_v26 = vrot.slane %v3306_v12, 3 }
 0x124   : > { %v1036_v38 = vadd.f32 %v5219_v57, %v6584_v60  ;;  %v6697_v7 = vadd.f32 %v1316_v30, %v1012_v31  ;;  %v3291_v31 = vor.u32 %v3290_v16, %v3287_v44 }
 0x125   : > { %v1027_v53 = vpop.f32.mrf.mxu1  ;;  %v5262_v24 = vpop.f32.mrf.mxu0  ;;  %5513 = vmatmul.mubr.msk.bf16.gmra.mxu0 %vm634_vm1, %v6321_v63  ;;  %v3294_v63 = vshrl.u32 %v6495_v39, 16  ;;  %v3283_v62 = vsel %vm3203_vm6, %v3273_v8, %v3282_v37 }
 0x126   : > { %v1028_v27 = vadd.f32 %v1027_v53, %v6595_v14  ;;  %v6704_v45 = vadd.f32 %v5262_v24, %v1033_v49  ;;  %5516 = vmatprep.mubr.msk.bf16.mxu0 %vm634_vm1, %v6343_v43  ;;  %v3297_v14 = vshll.u32 %v6495_v39, 16  ;;  %v3303_v43 = vshrl.u32 %v6503_v51, 16 }
 0x127   : > { %v5222_v60 = vpop.f32.mrf.mxu1  ;;  %5473 = vmatmul.mubr.msk.bf16.gmra.mxu1 %vm634_vm1, %v3265_v29  ;;  %v1329_v54 = vpop.f32.mrf.mxu0  ;;  %v7303_v49 = vrot.slane %v6334_v9, 3  ;;  %v3296_v55 = vrot.slane %v3294_v63, 2  ;;  %v3292_v30 = vsel %vm3203_vm6, %v3282_v37, %v3291_v31  ;;  %v3695_v53 = vrot.slane %v6471_v32, 3  ;;  %v7305_v63 = vld [vmem:[#allocation2_spill] sm:$0xff] }
 0x128   : > { %v6710_v18 = vadd.f32 %v1329_v54, %v1025_v17  ;;  %5476 = vmatprep.mubr.msk.bf16.mxu1 %vm634_vm1, %v3274_v23  ;;  %v1049_v3 = vadd.f32 %v5222_v60, %v6448_v56  ;;  %v3299_v21 = vrot.slane %v3297_v14, 3  ;;  %v3305_v11 = vrot.slane %v3303_v43, 2  ;;  %v7304_v60 = vld [vmem:[#allocation10_spill] sm:$0xff] }
 0x129   : > { %v1040_v25 = vpop.f32.mrf.mxu1  ;;  %v5263_v52 = vpop.f32.mrf.mxu0  ;;  %v3692_v46 = vsel %vm3677_vm5, %v7303_v49, %v3691_v35  ;;  %v3693_v56 = vrot.slane %v6463_v5, 3  ;;  %v3315_v24 = vshll.u32 %v6527_v59, 16  ;;  %v3321_v54 = vshrl.u32 %v7304_v60, 16 }
 0x12a   : > { %v6717_v28 = vadd.f32 %v5263_v52, %v1036_v38  ;;  %v1041_v8 = vadd.f32 %v1040_v25, %v6457_v33  ;;  %v3300_v33 = vor.u32 %v3299_v21, %v3296_v55  ;;  %v3309_v5 = vor.u32 %v3308_v26, %v3305_v11 }
 0x12b   : > { %v5223_v48 = vpop.f32.mrf.mxu1  ;;  %v1332_v10 = vpop.f32.mrf.mxu0  ;;  %v3324_v37 = vshll.u32 %v7304_v60, 16  ;;  %v3694_v25 = vsel %vm3677_vm5, %v3691_v35, %v3693_v56  ;;  %v3696_v43 = vsel %vm3677_vm5, %v3693_v56, %v3695_v53  ;;  %v3697_v26 = vrot.slane %v6495_v39, 3 }
 0x12c   : > { %v6724_v36 = vadd.f32 %v1332_v10, %v1028_v27  ;;  %v1052_v23 = vadd.f32 %v5223_v48, %v6465_v13  ;;  %v3317_v48 = vrot.slane %v3315_v24, 3  ;;  %v7306_v10 = vld [vmem:[#allocation3_spill] sm:$0xff]  ;;  %v3310_v21 = vsel %vm3203_vm6, %v3300_v33, %v3309_v5 }
 0x12d   : > { %v1043_v17 = vpop.f32.mrf.mxu1  ;;  %v5266_v57 = vpop.f32.mrf.mxu0  ;;  %5517 = vmatmul.mubr.msk.bf16.gmra.mxu0 %vm634_vm1, %v6351_v19  ;;  %v3312_v19 = vshrl.u32 %v6527_v59, 16  ;;  %v3326_v35 = vrot.slane %v3324_v37, 3  ;;  %v7310_v37 = vld [vmem:[#allocation16_spill] sm:$0xff] }
 0x12e   : > { %v6730_v9 = vadd.f32 %v5266_v57, %v1049_v3  ;;  %5520 = vmatprep.mubr.msk.bf16.mxu0 %vm634_vm1, %v3692_v46  ;;  %v1044_v32 = vadd.f32 %v1043_v17, %v7305_v63  ;;  %v3301_v46 = vsel %vm3203_vm6, %v3291_v31, %v3300_v33  ;;  %v3323_v17 = vrot.slane %v3321_v54, 2  ;;  %v7307_v57 = vld [vmem:[#allocation4_spill] sm:$0xff] }
 0x12f   : > { %v5226_v38 = vpop.f32.mrf.mxu1  ;;  %5477 = vmatmul.mubr.msk.bf16.gmra.mxu1 %vm634_vm1, %v3283_v62  ;;  %v1345_v29 = vpop.f32.mrf.mxu0  ;;  %v3314_v12 = vrot.slane %v3312_v19, 2  ;;  %v3339_v63 = vshrl.u32 %v7310_v37, 16 }
 0x130   : > { %v6739_v44 = vadd.f32 %v1345_v29, %v1041_v8  ;;  %5480 = vmatprep.mubr.msk.bf16.mxu1 %vm634_vm1, %v3292_v30  ;;  %v1065_v62 = vadd.f32 %v5226_v38, %v7306_v10  ;;  %v3699_v38 = vrot.slane %v6503_v51, 3  ;;  %v7308_v29 = vld [vmem:[#allocation5_spill] sm:$0xff]  ;;  %v3327_v39 = vor.u32 %v3326_v35, %v3323_v17 }
 0x131   : > { %v1056_v16 = vpop.f32.mrf.mxu1  ;;  %v5267_v27 = vpop.f32.mrf.mxu0  ;;  %v3318_v56 = vor.u32 %v3317_v48, %v3314_v12 }
 0x132   : > { %v6745_v14 = vadd.f32 %v5267_v27, %v1052_v23  ;;  %v1057_v30 = vadd.f32 %v1056_v16, %v7307_v57  ;;  %v7309_v23 = vld [vmem:[#allocation14_spill] sm:$0xff]  ;;  %v3700_v10 = vsel %vm3677_vm5, %v3697_v26, %v3699_v38 }
 0x133   : > { %v5227_v52 = vpop.f32.mrf.mxu1  ;;  %v1348_v13 = vpop.f32.mrf.mxu0  ;;  %v3330_v33 = vshrl.u32 %v7309_v23, 16  ;;  %v3333_v16 = vshll.u32 %v7309_v23, 16  ;;  %v3319_v48 = vsel %vm3203_vm6, %v3309_v5, %v3318_v56  ;;  %v3701_v5 = vrot.slane %v6527_v59, 3 }
 0x134   : > { %v6750_v49 = vadd.f32 %v1348_v13, %v1044_v32  ;;  %v1068_v19 = vadd.f32 %v5227_v52, %v7308_v29  ;;  %v3342_v32 = vshll.u32 %v7310_v37, 16  ;;  %v3698_v52 = vsel %vm3677_vm5, %v3695_v53, %v3697_v26 }
 0x135   : > { %v1059_v3 = vpop.f32.mrf.mxu1  ;;  %v5270_v55 = vpop.f32.mrf.mxu0  ;;  %5521 = vmatmul.mubr.msk.bf16.gmra.mxu0 %vm634_vm1, %v3694_v25  ;;  %v7311_v25 = vld [vmem:[#allocation6_spill] sm:$0xff]  ;;  %v3335_v17 = vrot.slane %v3333_v16, 3  ;;  %v3348_v16 = vshrl.u32 %v6593_v50, 16 }
 0x136   : > { %v6756_v11 = vadd.f32 %v5270_v55, %v1065_v62  ;;  %5524 = vmatprep.mubr.msk.bf16.mxu0 %vm634_vm1, %v3696_v43  ;;  %v1060_v13 = vadd.f32 %v1059_v3, %v7311_v25  ;;  %v7312_v62 = vld [vmem:[#allocation7_spill] sm:$0xff]  ;;  %v3328_v3 = vsel %vm3203_vm6, %v3318_v56, %v3327_v39  ;;  %v3344_v53 = vrot.slane %v3342_v32, 3 }
 0x137   : > { %v5230_v8 = vpop.f32.mrf.mxu1  ;;  %5481 = vmatmul.mubr.msk.bf16.gmra.mxu1 %vm634_vm1, %v3301_v46  ;;  %v1361_v31 = vpop.f32.mrf.mxu0  ;;  %v3351_v56 = vshll.u32 %v6593_v50, 16 }
 0x138   : > { %v6763_v24 = vadd.f32 %v1361_v31, %v1057_v30  ;;  %5484 = vmatprep.mubr.msk.bf16.mxu1 %vm634_vm1, %v3310_v21  ;;  %v1081_v46 = vadd.f32 %v5230_v8, %v7312_v62  ;;  %v3332_v21 = vrot.slane %v3330_v33, 2  ;;  %v3341_v30 = vrot.slane %v3339_v63, 2  ;;  %v7313_v31 = vld [vmem:[#allocation8_spill] sm:$0xff] }
 0x139   : > { %v1072_v27 = vpop.f32.mrf.mxu1  ;;  %v5271_v54 = vpop.f32.mrf.mxu0  ;;  %v3703_v33 = vrot.slane %v7304_v60, 3  ;;  %v7315_v60 = vld [vmem:[#allocation11_spill] sm:$0xff]  ;;  %v3702_v62 = vsel %vm3677_vm5, %v3699_v38, %v3701_v5 }
 0x13a   : > { %v6771_v51 = vadd.f32 %v5271_v54, %v1068_v19  ;;  %v1073_v29 = vadd.f32 %v1072_v27, %v7313_v31  ;;  %v7314_v54 = vld [vmem:[#allocation9_spill] sm:$0xff]  ;;  %v3336_v27 = vor.u32 %v3335_v17, %v3332_v21  ;;  %v3350_v31 = vrot.slane %v3348_v16, 2  ;;  %v6802_v21 = vld [vmem:[%s5761_s30 + $0xa0] ss:$0 sps:$4 sm:$0x77]   ;;  %v7316_v17 = vld [vmem:[#allocation12_spill] sm:$0xff] }
 0x13b   : > { %v5231_v43 = vpop.f32.mrf.mxu1  ;;  %v1364_v12 = vpop.f32.mrf.mxu0  ;;  %s5553_s30 = smul.u32 144, %s7326_s15 }
 0x13c   : > { %v6777_v55 = vadd.f32 %v1364_v12, %v1060_v13  ;;  %v1084_v63 = vadd.f32 %v5231_v43, %v7314_v54  ;;  %v3345_v13 = vor.u32 %v3344_v53, %v3341_v30  ;;  %v3360_v12 = vshll.u32 %v6599_v4, 16 }
 0x13d   : > { %v1075_v35 = vpop.f32.mrf.mxu1  ;;  %v5274_v57 = vpop.f32.mrf.mxu0  ;;  %5525 = vmatmul.mubr.msk.bf16.gmra.mxu0 %vm634_vm1, %v3698_v52  ;;  %v3357_v52 = vshrl.u32 %v6599_v4, 16  ;;  %s7065_s8 = scalar_lea.vmem %s7277_s3, %s5553_s30  ;;  %s7095_s13 = scalar_lea.vmem %s7278_s4, %s5553_s30 }
 0x13e   : > { %v6782_v19 = vadd.f32 %v5274_v57, %v1081_v46  ;;  %5528 = vmatprep.mubr.msk.bf16.mxu0 %vm634_vm1, %v3700_v10  ;;  %v3704_v57 = vsel %vm3677_vm5, %v3701_v5, %v3703_v33  ;;  %v3346_v38 = vsel %vm3203_vm6, %v3336_v27, %v3345_v13 }
 0x13f   : > { %v5234_v26 = vpop.f32.mrf.mxu1  ;;  %5485 = vmatmul.mubr.msk.bf16.gmra.mxu1 %vm634_vm1, %v3319_v48  ;;  %v1377_v8 = vpop.f32.mrf.mxu0  ;;  %v1076_v48 = vadd.f32 %v1075_v35, %v7315_v60  ;;  %v3359_v54 = vrot.slane %v3357_v52, 2 }
 0x140   : > { %v6791_v32 = vadd.f32 %v1377_v8, %v1073_v29  ;;  %5488 = vmatprep.mubr.msk.bf16.mxu1 %vm634_vm1, %v3328_v3  ;;  %v3353_v3 = vrot.slane %v3351_v56, 3  ;;  %v1097_v30 = vadd.f32 %v5234_v26, %v7316_v17  ;;  %v3337_v29 = vsel %vm3203_vm6, %v3327_v39, %v3336_v27  ;;  %v7318_v27 = vld [vmem:[#allocation15_spill] sm:$0xff] }
 0x141   : > { %v1088_v25 = vpop.f32.mrf.mxu1  ;;  %v5275_v59 = vpop.f32.mrf.mxu0  ;;  %v3705_v26 = vrot.slane %v7309_v23, 3 }
 0x142   : > { %v6797_v10 = vadd.f32 %v5275_v59, %v1084_v63  ;;  %v3362_v63 = vrot.slane %v3360_v12, 3  ;;  %v7317_v59 = vld [vmem:[#allocation13_spill] sm:$0xff]  ;;  %v3354_v60 = vor.u32 %v3353_v3, %v3350_v31  ;;  %v7320_v31 = vld [vmem:[#allocation18_spill] sm:$0xff] }
 0x143   : > { %v5235_v43 = vpop.f32.mrf.mxu1  ;;  %v1380_v46 = vpop.f32.mrf.mxu0  ;;  %v1089_v5 = vadd.f32 %v1088_v25, %v7317_v59 }
 0x144   : > { %v6805_v53 = vadd.f32 %v1380_v46, %v1076_v48  ;;  %v3707_v48 = vrot.slane %v7310_v37, 3  ;;  %v1100_v52 = vadd.f32 %v5235_v43, %v7318_v27  ;;  %v3369_v46 = vshll.u32 %v6802_v21, 16 }
 0x145   : > { %v1091_v8 = vpop.f32.mrf.mxu1  ;;  %v5278_v35 = vpop.f32.mrf.mxu0  ;;  %5529 = vmatmul.mubr.msk.bf16.gmra.mxu0 %vm634_vm1, %v3702_v62  ;;  %v3366_v62 = vshrl.u32 %v6802_v21, 16  ;;  %v3363_v17 = vor.u32 %v3362_v63, %v3359_v54 }
 0x146   : > { %v6811_v16 = vadd.f32 %v5278_v35, %v1097_v30  ;;  %5532 = vmatprep.mubr.msk.bf16.mxu0 %vm634_vm1, %v3704_v57  ;;  %v7319_v30 = vld [vmem:[#allocation17_spill] sm:$0xff]  ;;  %v3706_v35 = vsel %vm3677_vm5, %v3703_v33, %v3705_v26  ;;  %v3371_v54 = vrot.slane %v3369_v46, 3 }
 0x147   : > { %v5290_v56 = vpop.f32.mrf.mxu1  ;;  %5489 = vmatmul.mubr.msk.bf16.gmra.mxu1 %vm634_vm1, %v3337_v29  ;;  %v1393_v39 = vpop.f32.mrf.mxu0  ;;  %v1092_v29 = vadd.f32 %v1091_v8, %v7319_v30  ;;  %v3364_v27 = vsel %vm3203_vm6, %v3354_v60, %v3363_v17 }
 0x148   : > { %v1876_v12 = vadd.f32 %v5290_v56, %v6604_v47  ;;  %v6820_v25 = vadd.f32 %v1393_v39, %v1089_v5  ;;  %5492 = vmatprep.mubr.msk.bf16.mxu1 %vm634_vm1, %v3346_v38  ;;  %v3355_v47 = vsel %vm3203_vm6, %v3345_v13, %v3354_v60  ;;  %v3708_v5 = vsel %vm3677_vm5, %v3705_v26, %v3707_v48 }
 0x149   : > { %v1731_v23 = vpop.f32.mrf.mxu1  ;;  %v5279_v57 = vpop.f32.mrf.mxu0  ;;  %v3368_v39 = vrot.slane %v3366_v62, 2  ;;  %v3709_v13 = vrot.slane %v6593_v50, 3  ;;  %v3711_v62 = vrot.slane %v6599_v4, 3 }
 0x14a   : > { %v1874_v3 = vadd.f32 %v1731_v23, %v7320_v31  ;;  %v6826_v37 = vadd.f32 %v5279_v57, %v1100_v52 }
 0x14b   : > { %v5291_v43 = vpop.f32.mrf.mxu1  ;;  %v1396_v59 = vpop.f32.mrf.mxu0  ;;  %v3372_v60 = vor.u32 %v3371_v54, %v3368_v39  ;;  %v3710_v50 = vsel %vm3677_vm5, %v3707_v48, %v3709_v13  ;;  %v3713_v48 = vrot.slane %v6802_v21, 3 }
 0x14c   : > { %v1877_v38 = vadd.f32 %v5291_v43, %v6621_v34  ;;  %v6832_v56 = vadd.f32 %v1396_v59, %v1092_v29 }
 0x14d   : > { %v1734_v63 = vpop.f32.mrf.mxu1  ;;  %v5334_v8 = vpop.f32.mrf.mxu0  ;;  %5533 = vmatmul.mubr.msk.bf16.gmra.mxu0 %vm634_vm1, %v3706_v35  ;;  %v3712_v35 = vsel %vm3677_vm5, %v3709_v13, %v3711_v62 }
 0x14e   : > { %v1875_v33 = vadd.f32 %v1734_v63, %v6627_v41  ;;  %v6837_v52 = vadd.f32 %v5334_v8, %v1876_v12  ;;  %5536 = vmatprep.mubr.msk.bf16.mxu0 %vm634_vm1, %v3708_v5 }
 0x14f   : > { %v5294_v26 = vpop.f32.mrf.mxu1  ;;  %5493 = vmatmul.mubr.msk.bf16.gmra.mxu1 %vm634_vm1, %v3355_v47  ;;  %v2205_v34 = vpop.f32.mrf.mxu0 }
 0x150   : > { %v1880_v46 = vadd.f32 %v5294_v26, %v6632_v0  ;;  %v6844_v23 = vadd.f32 %v2205_v34, %v1874_v3  ;;  %5496 = vmatprep.mubr.msk.bf16.mxu1 %vm634_vm1, %v3364_v27  ;;  %v3373_v3 = vsel %vm3203_vm6, %v3363_v17, %v3372_v60 }
 0x151   : > { %v1747_v41 = vpop.f32.mrf.mxu1  ;;  %v5335_v12 = vpop.f32.mrf.mxu0 }
 0x152   : > { %v1878_v57 = vadd.f32 %v1747_v41, %v6640_v6  ;;  %v6848_v30 = vadd.f32 %v5335_v12, %v1877_v38 }
 0x153   : > { %v5295_v29 = vpop.f32.mrf.mxu1  ;;  %v2208_v31 = vpop.f32.mrf.mxu0 }
 0x154   : > { %v1881_v4 = vadd.f32 %v5295_v29, %v6646_v40  ;;  %v6853_v0 = vadd.f32 %v2208_v31, %v1875_v33 }
 0x155   : > { %v1750_v43 = vpop.f32.mrf.mxu1  ;;  %v5338_v59 = vpop.f32.mrf.mxu0  ;;  %5537 = vmatmul.mubr.msk.bf16.gmra.mxu0 %vm634_vm1, %v3710_v50 }
 0x156   : > { %v1879_v6 = vadd.f32 %v1750_v43, %v6650_v2  ;;  %v6858_v47 = vadd.f32 %v5338_v59, %v1880_v46  ;;  %5540 = vmatprep.mubr.msk.bf16.mxu0 %vm634_vm1, %v3712_v35  ;;  %v3714_v2 = vsel %vm3677_vm5, %v3711_v62, %v3713_v48 }
 0x157   : > { %v5298_v5 = vpop.f32.mrf.mxu1  ;;  %5497 = vmatmul.mubr.msk.bf16.gmra.mxu1 %vm634_vm1, %v3373_v3  ;;  %v2221_v40 = vpop.f32.mrf.mxu0 }
 0x158   : > { %v1884_v38 = vadd.f32 %v5298_v5, %v6656_v22  ;;  %v6864_v39 = vadd.f32 %v2221_v40, %v1878_v57 }
 0x159   : > { %v1763_v17 = vpop.f32.mrf.mxu1  ;;  %v5339_v54 = vpop.f32.mrf.mxu0 }
 0x15a   : > { %v1882_v63 = vadd.f32 %v1763_v17, %v6662_v61  ;;  %v6867_v8 = vadd.f32 %v5339_v54, %v1881_v4 }
 0x15b   : > { %v5299_v27 = vpop.f32.mrf.mxu1  ;;  %v2224_v33 = vpop.f32.mrf.mxu0 }
 0x15c   : > { %v1885_v21 = vadd.f32 %v5299_v27, %v6670_v58  ;;  %v6871_v13 = vadd.f32 %v2224_v33, %v1879_v6 }
 0x15d   : > { %v1766_v26 = vpop.f32.mrf.mxu1  ;;  %v5342_v34 = vpop.f32.mrf.mxu0  ;;  %5541 = vmatmul.mubr.msk.bf16.gmra.mxu0 %vm634_vm1, %v3714_v2 }
 0x15e   : > { %v1883_v22 = vadd.f32 %v1766_v26, %v6674_v1  ;;  %v6875_v46 = vadd.f32 %v5342_v34, %v1884_v38 }
 0x15f   : > { %v5302_v60 = vpop.f32.mrf.mxu1  ;;  %v2237_v61 = vpop.f32.mrf.mxu0 }
 0x160   : > { %v1888_v41 = vadd.f32 %v5302_v60, %v6680_v42  ;;  %v6878_v12 = vadd.f32 %v2237_v61, %v1882_v63 }
 0x161   : > { %v1779_v62 = vpop.f32.mrf.mxu1  ;;  %v5343_v57 = vpop.f32.mrf.mxu0 }
 0x162   : > { %v1886_v58 = vadd.f32 %v1779_v62, %v6688_v15  ;;  %v6881_v50 = vadd.f32 %v5343_v57, %v1885_v21 }
 0x163   : > { %v5303_v29 = vpop.f32.mrf.mxu1  ;;  %v2240_v31 = vpop.f32.mrf.mxu0 }
 0x164   : > { %v1889_v35 = vadd.f32 %v5303_v29, %v6694_v20  ;;  %v6884_v4 = vadd.f32 %v2240_v31, %v1883_v22 }
 0x165   : > { %v1782_v1 = vpop.f32.mrf.mxu1  ;;  %v5346_v3 = vpop.f32.mrf.mxu0 }
 0x166   : > { %v1887_v43 = vadd.f32 %v1782_v1, %v6697_v7  ;;  %v6887_v59 = vadd.f32 %v5346_v3, %v1888_v41 }
 0x167   : > { %v5306_v42 = vpop.f32.mrf.mxu1  ;;  %v2253_v6 = vpop.f32.mrf.mxu0 }
 0x168   : > { %v1892_v48 = vadd.f32 %v5306_v42, %v6704_v45  ;;  %v6890_v5 = vadd.f32 %v2253_v6, %v1886_v58 }
 0x169   : > { %v1795_v15 = vpop.f32.mrf.mxu1  ;;  %v5347_v40 = vpop.f32.mrf.mxu0 }
 0x16a   : > { %v1890_v38 = vadd.f32 %v1795_v15, %v6710_v18  ;;  %v6893_v17 = vadd.f32 %v5347_v40, %v1889_v35 }
 0x16b   : > { %v5307_v20 = vpop.f32.mrf.mxu1  ;;  %v2256_v54 = vpop.f32.mrf.mxu0 }
 0x16c   : > { %v1893_v63 = vadd.f32 %v5307_v20, %v6717_v28  ;;  %v6896_v2 = vadd.f32 %v2256_v54, %v1887_v43 }
 0x16d   : > { %v1798_v7 = vpop.f32.mrf.mxu1  ;;  %v5350_v27 = vpop.f32.mrf.mxu0 }
 0x16e   : > { %v1891_v33 = vadd.f32 %v1798_v7, %v6724_v36  ;;  %v6899_v21 = vadd.f32 %v5350_v27, %v1892_v48 }
 0x16f   : > { %v5310_v45 = vpop.f32.mrf.mxu1  ;;  %v2269_v26 = vpop.f32.mrf.mxu0 }
 0x170   : > { %v1896_v34 = vadd.f32 %v5310_v45, %v6730_v9  ;;  %v6902_v22 = vadd.f32 %v2269_v26, %v1890_v38 }
 0x171   : > { %v1811_v18 = vpop.f32.mrf.mxu1  ;;  %v5351_v60 = vpop.f32.mrf.mxu0 }
 0x172   : > { %v1894_v61 = vadd.f32 %v1811_v18, %v6739_v44  ;;  %v6905_v41 = vadd.f32 %v5351_v60, %v1893_v63 }
 0x173   : > { %v5311_v28 = vpop.f32.mrf.mxu1  ;;  %v2272_v62 = vpop.f32.mrf.mxu0 }
 0x174   : > { %v1897_v57 = vadd.f32 %v5311_v28, %v6745_v14  ;;  %v6908_v58 = vadd.f32 %v2272_v62, %v1891_v33 }
 0x175   : > { %v1814_v36 = vpop.f32.mrf.mxu1  ;;  %v5354_v29 = vpop.f32.mrf.mxu0 }
 0x176   : > { %v1895_v31 = vadd.f32 %v1814_v36, %v6750_v49  ;;  %v6911_v35 = vadd.f32 %v5354_v29, %v1896_v34 }
 0x177   : > { %v5314_v9 = vpop.f32.mrf.mxu1  ;;  %v2285_v1 = vpop.f32.mrf.mxu0 }
 0x178   : > { %v1900_v3 = vadd.f32 %v5314_v9, %v6756_v11  ;;  %v6914_v43 = vadd.f32 %v2285_v1, %v1894_v61 }
 0x179   : > { %v1827_v44 = vpop.f32.mrf.mxu1  ;;  %v5355_v42 = vpop.f32.mrf.mxu0 }
 0x17a   : > { %v1898_v6 = vadd.f32 %v1827_v44, %v6763_v24  ;;  %v6917_v48 = vadd.f32 %v5355_v42, %v1897_v57 }
 0x17b   : > { %v5315_v14 = vpop.f32.mrf.mxu1  ;;  %v2288_v15 = vpop.f32.mrf.mxu0 }
 0x17c   : > { %v1901_v40 = vadd.f32 %v5315_v14, %v6771_v51  ;;  %v6920_v38 = vadd.f32 %v2288_v15, %v1895_v31 }
 0x17d   : > { %v1830_v49 = vpop.f32.mrf.mxu1  ;;  %v5358_v20 = vpop.f32.mrf.mxu0 }
 0x17e   : > { %v1899_v54 = vadd.f32 %v1830_v49, %v6777_v55  ;;  %v6923_v63 = vadd.f32 %v5358_v20, %v1900_v3 }
 0x17f   : > { %v5318_v11 = vpop.f32.mrf.mxu1  ;;  %v2301_v7 = vpop.f32.mrf.mxu0 }
 0x180   : > { %v1904_v27 = vadd.f32 %v5318_v11, %v6782_v19  ;;  %v6926_v33 = vadd.f32 %v2301_v7, %v1898_v6 }
 0x181   : > { %v1843_v24 = vpop.f32.mrf.mxu1  ;;  %v5359_v45 = vpop.f32.mrf.mxu0 }
 0x182   : > { %v1902_v26 = vadd.f32 %v1843_v24, %v6791_v32  ;;  %v6929_v34 = vadd.f32 %v5359_v45, %v1901_v40 }
 0x183   : > { %v5319_v51 = vpop.f32.mrf.mxu1  ;;  %v2304_v18 = vpop.f32.mrf.mxu0 }
 0x184   : > { %v1905_v60 = vadd.f32 %v5319_v51, %v6797_v10  ;;  %v6932_v61 = vadd.f32 %v2304_v18, %v1899_v54 }
 0x185   : > { %v1846_v55 = vpop.f32.mrf.mxu1  ;;  %v5362_v28 = vpop.f32.mrf.mxu0 }
 0x186   : > { %v1903_v62 = vadd.f32 %v1846_v55, %v6805_v53  ;;  %v6935_v57 = vadd.f32 %v5362_v28, %v1904_v27 }
 0x187   : > { %v5322_v19 = vpop.f32.mrf.mxu1  ;;  %v2317_v36 = vpop.f32.mrf.mxu0 }
 0x188   : > { %v1908_v29 = vadd.f32 %v5322_v19, %v6811_v16  ;;  %v6938_v31 = vadd.f32 %v2317_v36, %v1902_v26 }
 0x189   : > { %v1859_v32 = vpop.f32.mrf.mxu1  ;;  %v5363_v9 = vpop.f32.mrf.mxu0 }
 0x18a   : > { %v1906_v1 = vadd.f32 %v1859_v32, %v6820_v25  ;;  %v6941_v3 = vadd.f32 %v5363_v9, %v1905_v60 }
 0x18b   : > { %v5323_v10 = vpop.f32.mrf.mxu1  ;;  %v2320_v44 = vpop.f32.mrf.mxu0 }
 0x18c   : > { %v1909_v42 = vadd.f32 %v5323_v10, %v6826_v37  ;;  %v6944_v6 = vadd.f32 %v2320_v44, %v1903_v62 }
 0x18d   : > { %v1862_v53 = vpop.f32.mrf.mxu1  ;;  %v5366_v14 = vpop.f32.mrf.mxu0 }
 0x18e   : > { %v1907_v15 = vadd.f32 %v1862_v53, %v6832_v56  ;;  %v6947_v40 = vadd.f32 %v5366_v14, %v1908_v29 }
 0x18f   : > { %v5378_v16 = vpop.f32.mrf.mxu1  ;;  %v2333_v49 = vpop.f32.mrf.mxu0 }
 0x190   : > { %v2691_v20 = vadd.f32 %v5378_v16, %v6837_v52  ;;  %v6950_v54 = vadd.f32 %v2333_v49, %v1906_v1 }
 0x191   : > { %v2546_v25 = vpop.f32.mrf.mxu1  ;;  %v5367_v11 = vpop.f32.mrf.mxu0 }
 0x192   : > { %v2689_v7 = vadd.f32 %v2546_v25, %v6844_v23  ;;  %v6953_v27 = vadd.f32 %v5367_v11, %v1909_v42 }
 0x193   : > { %v5379_v37 = vpop.f32.mrf.mxu1  ;;  %v2336_v24 = vpop.f32.mrf.mxu0 }
 0x194   : > { %v2692_v45 = vadd.f32 %v5379_v37, %v6848_v30  ;;  %v6956_v26 = vadd.f32 %v2336_v24, %v1907_v15 }
 0x195   : > { %v2549_v56 = vpop.f32.mrf.mxu1  ;;  %v5422_v51 = vpop.f32.mrf.mxu0 }
 0x196   : > { %v2690_v18 = vadd.f32 %v2549_v56, %v6853_v0  ;;  %v6959_v60 = vadd.f32 %v5422_v51, %v2691_v20 }
 0x197   : > { %v5382_v52 = vpop.f32.mrf.mxu1  ;;  %v3012_v55 = vpop.f32.mrf.mxu0 }
 0x198   : > { %v2695_v28 = vadd.f32 %v5382_v52, %v6858_v47  ;;  %v6962_v62 = vadd.f32 %v3012_v55, %v2689_v7 }
 0x199   : > { %v2562_v23 = vpop.f32.mrf.mxu1  ;;  %v5423_v19 = vpop.f32.mrf.mxu0 }
 0x19a   : > { %v2693_v36 = vadd.f32 %v2562_v23, %v6864_v39  ;;  %v6965_v29 = vadd.f32 %v5423_v19, %v2692_v45 }
 0x19b   : > { %v5383_v30 = vpop.f32.mrf.mxu1  ;;  %v3015_v32 = vpop.f32.mrf.mxu0 }
 0x19c   : > { %v2696_v9 = vadd.f32 %v5383_v30, %v6867_v8  ;;  %v6968_v1 = vadd.f32 %v3015_v32, %v2690_v18 }
 0x19d   : > { %v2565_v0 = vpop.f32.mrf.mxu1  ;;  %v5426_v10 = vpop.f32.mrf.mxu0 }
 0x19e   : > { %v2694_v44 = vadd.f32 %v2565_v0, %v6871_v13  ;;  %v6971_v42 = vadd.f32 %v5426_v10, %v2695_v28 }
 0x19f   : > { %v5386_v47 = vpop.f32.mrf.mxu1  ;;  %v3028_v53 = vpop.f32.mrf.mxu0 }
 0x1a0   : > { %v2699_v14 = vadd.f32 %v5386_v47, %v6875_v46  ;;  %v6974_v15 = vadd.f32 %v3028_v53, %v2693_v36 }
 0x1a1   : > { %v2578_v39 = vpop.f32.mrf.mxu1  ;;  %v5427_v16 = vpop.f32.mrf.mxu0 }
 0x1a2   : > { %v2697_v49 = vadd.f32 %v2578_v39, %v6878_v12  ;;  %v6977_v20 = vadd.f32 %v5427_v16, %v2696_v9 }
 0x1a3   : > { %v5387_v8 = vpop.f32.mrf.mxu1  ;;  %v3031_v25 = vpop.f32.mrf.mxu0 }
 0x1a4   : > { %v2700_v11 = vadd.f32 %v5387_v8, %v6881_v50  ;;  %v6980_v7 = vadd.f32 %v3031_v25, %v2694_v44 }
 0x1a5   : > { %v2581_v13 = vpop.f32.mrf.mxu1  ;;  %v5430_v37 = vpop.f32.mrf.mxu0 }
 0x1a6   : > { %v2698_v24 = vadd.f32 %v2581_v13, %v6884_v4  ;;  %v6983_v45 = vadd.f32 %v5430_v37, %v2699_v14 }
 0x1a7   : > { %v5390_v46 = vpop.f32.mrf.mxu1  ;;  %v3044_v56 = vpop.f32.mrf.mxu0 }
 0x1a8   : > { %v2703_v51 = vadd.f32 %v5390_v46, %v6887_v59  ;;  %v6986_v18 = vadd.f32 %v3044_v56, %v2697_v49 }
 0x1a9   : > { %v2594_v12 = vpop.f32.mrf.mxu1  ;;  %v5431_v52 = vpop.f32.mrf.mxu0 }
 0x1aa   : > { %v2701_v55 = vadd.f32 %v2594_v12, %v6890_v5  ;;  %v6989_v28 = vadd.f32 %v5431_v52, %v2700_v11 }
 0x1ab   : > { %v5391_v50 = vpop.f32.mrf.mxu1  ;;  %v3047_v23 = vpop.f32.mrf.mxu0 }
 0x1ac   : > { %v2704_v19 = vadd.f32 %v5391_v50, %v6893_v17  ;;  %v6992_v36 = vadd.f32 %v3047_v23, %v2698_v24 }
 0x1ad   : > { %v2597_v4 = vpop.f32.mrf.mxu1  ;;  %v5434_v30 = vpop.f32.mrf.mxu0 }
 0x1ae   : > { %v2702_v32 = vadd.f32 %v2597_v4, %v6896_v2  ;;  %v6995_v9 = vadd.f32 %v5434_v30, %v2703_v51 }
 0x1af   : > { %v5394_v59 = vpop.f32.mrf.mxu1  ;;  %v3060_v0 = vpop.f32.mrf.mxu0 }
 0x1b0   : > { %v2707_v10 = vadd.f32 %v5394_v59, %v6899_v21  ;;  %v6998_v44 = vadd.f32 %v3060_v0, %v2701_v55 }
 0x1b1   : > { %v2610_v5 = vpop.f32.mrf.mxu1  ;;  %v5435_v47 = vpop.f32.mrf.mxu0 }
 0x1b2   : > { %v2705_v53 = vadd.f32 %v2610_v5, %v6902_v22  ;;  %v7001_v14 = vadd.f32 %v5435_v47, %v2704_v19 }
 0x1b3   : > { %v5395_v17 = vpop.f32.mrf.mxu1  ;;  %v3063_v39 = vpop.f32.mrf.mxu0 }
 0x1b4   : > { %v2708_v16 = vadd.f32 %v5395_v17, %v6905_v41  ;;  %v7004_v49 = vadd.f32 %v3063_v39, %v2702_v32 }
 0x1b5   : > { %v2613_v2 = vpop.f32.mrf.mxu1  ;;  %v5438_v8 = vpop.f32.mrf.mxu0 }
 0x1b6   : > { %v2706_v25 = vadd.f32 %v2613_v2, %v6908_v58  ;;  %v7007_v11 = vadd.f32 %v5438_v8, %v2707_v10 }
 0x1b7   : > { %v5398_v21 = vpop.f32.mrf.mxu1  ;;  %v3076_v13 = vpop.f32.mrf.mxu0 }
 0x1b8   : > { %v2711_v37 = vadd.f32 %v5398_v21, %v6911_v35  ;;  %v7010_v24 = vadd.f32 %v3076_v13, %v2705_v53 }
 0x1b9   : > { %v2626_v22 = vpop.f32.mrf.mxu1  ;;  %v5439_v46 = vpop.f32.mrf.mxu0 }
 0x1ba   : > { %v2709_v56 = vadd.f32 %v2626_v22, %v6914_v43  ;;  %v7013_v51 = vadd.f32 %v5439_v46, %v2708_v16 }
 0x1bb   : > { %v5399_v41 = vpop.f32.mrf.mxu1  ;;  %v3079_v12 = vpop.f32.mrf.mxu0 }
 0x1bc   : > { %v2712_v52 = vadd.f32 %v5399_v41, %v6917_v48  ;;  %v7016_v55 = vadd.f32 %v3079_v12, %v2706_v25 }
 0x1bd   : > { %v2629_v58 = vpop.f32.mrf.mxu1  ;;  %v5442_v50 = vpop.f32.mrf.mxu0 }
 0x1be   : > { %v2710_v23 = vadd.f32 %v2629_v58, %v6920_v38  ;;  %v7019_v19 = vadd.f32 %v5442_v50, %v2711_v37 }
 0x1bf   : > { %v5402_v35 = vpop.f32.mrf.mxu1  ;;  %v3092_v4 = vpop.f32.mrf.mxu0 }
 0x1c0   : > { %v2715_v30 = vadd.f32 %v5402_v35, %v6923_v63  ;;  %v7022_v32 = vadd.f32 %v3092_v4, %v2709_v56 }
 0x1c1   : > { %v2642_v43 = vpop.f32.mrf.mxu1  ;;  %v5443_v59 = vpop.f32.mrf.mxu0 }
 0x1c2   : > { %v2713_v0 = vadd.f32 %v2642_v43, %v6926_v33  ;;  %v7025_v10 = vadd.f32 %v5443_v59, %v2712_v52 }
 0x1c3   : > { %v5403_v48 = vpop.f32.mrf.mxu1  ;;  %v3095_v5 = vpop.f32.mrf.mxu0 }
 0x1c4   : > { %v2716_v47 = vadd.f32 %v5403_v48, %v6929_v34  ;;  %v7028_v53 = vadd.f32 %v3095_v5, %v2710_v23 }
 0x1c5   : > { %v2645_v38 = vpop.f32.mrf.mxu1  ;;  %v5446_v17 = vpop.f32.mrf.mxu0 }
 0x1c6   : > { %v2714_v39 = vadd.f32 %v2645_v38, %v6932_v61  ;;  %v7031_v16 = vadd.f32 %v5446_v17, %v2715_v30 }
 0x1c7   : > { %v5406_v63 = vpop.f32.mrf.mxu1  ;;  %v3108_v2 = vpop.f32.mrf.mxu0 }
 0x1c8   : > { %v2719_v8 = vadd.f32 %v5406_v63, %v6935_v57  ;;  %v7034_v25 = vadd.f32 %v3108_v2, %v2713_v0  ;;  %v4933_v2 = vld [vmem:[%s7065_s8 + $0x8] sm:$0xff]  }
 0x1c9   : > { %v2658_v33 = vpop.f32.mrf.mxu1  ;;  %v5447_v21 = vpop.f32.mrf.mxu0 }
 0x1ca   : > { %v2717_v13 = vadd.f32 %v2658_v33, %v6938_v31  ;;  %v7037_v37 = vadd.f32 %v5447_v21, %v2716_v47 }
 0x1cb   : > { %v5407_v34 = vpop.f32.mrf.mxu1  ;;  %v3111_v22 = vpop.f32.mrf.mxu0 }
 0x1cc   : > { %v2720_v46 = vadd.f32 %v5407_v34, %v6941_v3  ;;  %v7040_v56 = vadd.f32 %v3111_v22, %v2714_v39  ;;  %v7076_v34 = vld [vmem:[%s7276_s2] ss:$0 sm:$0xff] }
 0x1cd   : > { %v2661_v61 = vpop.f32.mrf.mxu1  ;;  %v5450_v41 = vpop.f32.mrf.mxu0  ;;  %v4862_v22 = vld [vmem:[%s7065_s8] sm:$0xff]  }
 0x1ce   : > { %v2718_v12 = vadd.f32 %v2661_v61, %v6944_v6  ;;  %v7043_v57 = vadd.f32 %v5450_v41, %v2719_v8  ;;  %v4867_v41 = vunpack.c.l.bf16 %v4933_v2 }
 0x1cf   : > { %v5410_v52 = vpop.f32.mrf.mxu1  ;;  %v3124_v58 = vpop.f32.mrf.mxu0 }
 0x1d0   : > { %v2723_v50 = vadd.f32 %v5410_v52, %v6947_v40  ;;  %v7046_v31 = vadd.f32 %v3124_v58, %v2717_v13 }
 0x1d1   : > { %v2674_v23 = vpop.f32.mrf.mxu1  ;;  %v5451_v35 = vpop.f32.mrf.mxu0 }
 0x1d2   : > { %v2721_v3 = vadd.f32 %v2674_v23, %v6950_v54  ;;  %v7049_v4 = vadd.f32 %v5451_v35, %v2720_v46  ;;  %v4863_v23 = vunpack.c.l.bf16 %v4862_v22 }
 0x1d3   : > { %v5411_v30 = vpop.f32.mrf.mxu1  ;;  %v3127_v43 = vpop.f32.mrf.mxu0 }
 0x1d4   : > { %v2724_v59 = vadd.f32 %v5411_v30, %v6953_v27  ;;  %v7052_v6 = vadd.f32 %v3127_v43, %v2718_v12 }
 0x1d5   : > { %v2677_v0 = vpop.f32.mrf.mxu1  ;;  %v5454_v48 = vpop.f32.mrf.mxu0 }
 0x1d6   : > { %v2722_v40 = vadd.f32 %v2677_v0, %v6956_v26  ;;  %v7056_v5 = vadd.f32 %v5454_v48, %v2723_v50 }
 0x1d7   : > { %v5466_v47 = vpop.f32.mrf.mxu1  ;;  %v3140_v38 = vpop.f32.mrf.mxu0 }
 0x1d8   : > { %v7058_v17 = vadd.f32 %v3140_v38, %v2721_v3  ;;  %v3631_v8 = vadd.f32 %v5466_v47, %v6959_v60 }
 0x1d9   : > { %v3486_v54 = vpop.f32.mrf.mxu1  ;;  %v5455_v27 = vpop.f32.mrf.mxu0 }
 0x1da   : > { %v7067_v39 = vadd.f32 %v5455_v27, %v2724_v59  ;;  %v3629_v46 = vadd.f32 %v3486_v54, %v6962_v62  ;;  %v4868_v62 = vunpack.c.h.bf16 %v4933_v2  ;;  %v4935_v54 = vld [vmem:[%s7065_s8 + $0x18] sm:$0xff]   ;;  %v7087_v27 = vld [vmem:[%s7065_s8 + $0x10] sm:$0xff]   ;;  %v4864_v2 = vunpack.c.h.bf16 %v4862_v22 }
 0x1db   : > { %v5467_v63 = vpop.f32.mrf.mxu1  ;;  %v3143_v26 = vpop.f32.mrf.mxu0 }
 0x1dc   : > { %v7071_v33 = vadd.f32 %v3143_v26, %v2722_v40  ;;  %v3632_v58 = vadd.f32 %v5467_v63, %v6965_v29 }
 0x1dd   : > { %v3489_v21 = vpop.f32.mrf.mxu1  ;;  %v5510_v13 = vpop.f32.mrf.mxu0 }
 0x1de   : > { %v3972_v61 = vadd.f32 %v5510_v13, %v3631_v8  ;;  %v3630_v0 = vadd.f32 %v3489_v21, %v6968_v1 }
 0x1df   : > { %v5470_v12 = vpop.f32.mrf.mxu1  ;;  %v3827_v52 = vpop.f32.mrf.mxu0 }
 0x1e0   : > { %v4015_v60 = vadd.f32 %v7076_v34, %v3972_v61  ;;  %v3970_v50 = vadd.f32 %v3827_v52, %v3629_v46  ;;  %v3635_v63 = vadd.f32 %v5470_v12, %v6971_v42  ;;  %v4875_v52 = vunpack.c.l.bf16 %v4935_v54 }
 0x1e1   : > { %v3502_v35 = vpop.f32.mrf.mxu1  ;;  %v5511_v3 = vpop.f32.mrf.mxu0 }
 0x1e2   : > { %v4123_v30 = vadd.f32 %v4867_v41, %v4015_v60  ;;  %v4013_v43 = vadd.f32 %v7076_v34, %v3970_v50  ;;  %v3973_v59 = vadd.f32 %v5511_v3, %v3632_v58  ;;  %v3633_v13 = vadd.f32 %v3502_v35, %v6974_v15 }
 0x1e3   : > { %v5471_v48 = vpop.f32.mrf.mxu1  ;;  %v3830_v40 = vpop.f32.mrf.mxu0  ;;  %v4871_v60 = vunpack.c.l.bf16 %v7087_v27 }
 0x1e4   : > { %v4159_v47 = vmax.f32 %v4123_v30, 0.0  ;;  %v4121_v29 = vadd.f32 %v4863_v23, %v4013_v43  ;;  %v4016_v38 = vadd.f32 %v7076_v34, %v3973_v59  ;;  %v3971_v26 = vadd.f32 %v3830_v40, %v3630_v0 }
 0x1e5   : > { %v3505_v1 = vpop.f32.mrf.mxu1  ;;  %v5514_v8 = vpop.f32.mrf.mxu0  ;;  %v3636_v22 = vadd.f32 %v5471_v48, %v6977_v20  ;;  %v4876_v59 = vunpack.c.h.bf16 %v4935_v54 }
 0x1e6   : > { %v4827_v21 = vpack.c.bf16 %v4159_v47, %v4159_v47  ;;  %v4157_v46 = vmax.f32 %v4121_v29, 0.0  ;;  %v4124_v61 = vadd.f32 %v4868_v62, %v4016_v38  ;;  %v4014_v41 = vadd.f32 %v7076_v34, %v3971_v26 }
 0x1e7   : > { %v5474_v42 = vpop.f32.mrf.mxu1  ;;  %v3976_v12 = vadd.f32 %v5514_v8, %v3635_v63  ;;  %v3843_v58 = vpop.f32.mrf.mxu0  ;;  %v3634_v0 = vadd.f32 %v3505_v1, %v6980_v7  ;;  %v4937_v8 = vld [vmem:[%s7065_s8 + $0x28] sm:$0xff]  }
 0x1e8   : > { %4340 = vst.msk [vmem:[%s7095_s13 + $0x8] sm:$0xf] %vm4337_vm7, %v4827_v21  ;;  %v4825_v50 = vpack.c.bf16 %v4157_v46, %v4157_v46  ;;  %v4160_v23 = vmax.f32 %v4124_v61, 0.0  ;;  %v3974_v3 = vadd.f32 %v3843_v58, %v3633_v13  ;;  %v4122_v15 = vadd.f32 %v4864_v2, %v4014_v41 }
 0x1e9   : > { %v4019_v35 = vadd.f32 %v7076_v34, %v3976_v12  ;;  %v3518_v30 = vpop.f32.mrf.mxu1  ;;  %v5515_v43 = vpop.f32.mrf.mxu0  ;;  %v4872_v2 = vunpack.c.h.bf16 %v7087_v27  ;;  %v3639_v7 = vadd.f32 %v5474_v42, %v6983_v45 }
 0x1ea   : > { %4338 = vst.msk [vmem:[%s7095_s13] sm:$0xf] %vm4337_vm7, %v4825_v50  ;;  %v4828_v62 = vpack.c.bf16 %v4160_v23, %v4160_v23  ;;  %v4017_v40 = vadd.f32 %v7076_v34, %v3974_v3  ;;  %v3977_v47 = vadd.f32 %v5515_v43, %v3636_v22  ;;  %v4158_v29 = vmax.f32 %v4122_v15, 0.0 }
 0x1eb   : > { %v4127_v20 = vadd.f32 %v4875_v52, %v4019_v35  ;;  %v5475_v48 = vpop.f32.mrf.mxu1  ;;  %v3846_v38 = vpop.f32.mrf.mxu0  ;;  %v4936_v52 = vld [vmem:[%s7065_s8 + $0x20] sm:$0xff]   ;;  %v4883_v22 = vunpack.c.l.bf16 %v4937_v8 }
 0x1ec   : > { %4341 = vst.msk [vmem:[%s7095_s13 + $0xc] sm:$0xf] %vm4337_vm7, %v4828_v62  ;;  %v4125_v63 = vadd.f32 %v4871_v60, %v4017_v40  ;;  %v4020_v26 = vadd.f32 %v7076_v34, %v3977_v47  ;;  %v3975_v54 = vadd.f32 %v3846_v38, %v3634_v0  ;;  %v4826_v21 = vpack.c.bf16 %v4158_v29, %v4158_v29 }
 0x1ed   : > { %v4163_v1 = vmax.f32 %v4127_v20, 0.0  ;;  %v3521_v13 = vpop.f32.mrf.mxu1  ;;  %v5518_v46 = vpop.f32.mrf.mxu0  ;;  %v3637_v60 = vadd.f32 %v3518_v30, %v6986_v18  ;;  %v3640_v42 = vadd.f32 %v5475_v48, %v6989_v28  ;;  %v4879_v62 = vunpack.c.l.bf16 %v4936_v52 }
 0x1ee   : > { %v4161_v61 = vmax.f32 %v4125_v63, 0.0  ;;  %v4128_v41 = vadd.f32 %v4876_v59, %v4020_v26  ;;  %v4018_v12 = vadd.f32 %v7076_v34, %v3975_v54  ;;  %4339 = vst.msk [vmem:[%s7095_s13 + $0x4] sm:$0xf] %vm4337_vm7, %v4826_v21  ;;  %v3980_v50 = vadd.f32 %v5518_v46, %v3639_v7  ;;  %v4939_v26 = vld [vmem:[%s7065_s8 + $0x38] sm:$0xff]  }
 0x1ef   : > { %v4831_v58 = vpack.c.bf16 %v4163_v1, %v4163_v1  ;;  %v5478_v27 = vpop.f32.mrf.mxu1  ;;  %v3859_v23 = vpop.f32.mrf.mxu0  ;;  %v4884_v30 = vunpack.c.h.bf16 %v4937_v8  ;;  %v3638_v40 = vadd.f32 %v3521_v13, %v6992_v36  ;;  %v4880_v63 = vunpack.c.h.bf16 %v4936_v52  ;;  %v4938_v52 = vld [vmem:[%s7065_s8 + $0x30] sm:$0xff]  }
 0x1f0   : > { %v4829_v45 = vpack.c.bf16 %v4161_v61, %v4161_v61  ;;  %v4164_v3 = vmax.f32 %v4128_v41, 0.0  ;;  %v4126_v15 = vadd.f32 %v4872_v2, %v4018_v12  ;;  %v4023_v35 = vadd.f32 %v7076_v34, %v3980_v50 }
 0x1f1   : > { %4344 = vst.msk [vmem:[%s7095_s13 + $0x18] sm:$0xf] %vm4337_vm7, %v4831_v58  ;;  %v3534_v43 = vpop.f32.mrf.mxu1  ;;  %v3978_v59 = vadd.f32 %v3859_v23, %v3637_v60  ;;  %v5519_v18 = vpop.f32.mrf.mxu0  ;;  %v3643_v2 = vadd.f32 %v5478_v27, %v6995_v9  ;;  %v4891_v12 = vunpack.c.l.bf16 %v4939_v26 }
 0x1f2   : > { %4342 = vst.msk [vmem:[%s7095_s13 + $0x10] sm:$0xf] %vm4337_vm7, %v4829_v45  ;;  %v4832_v0 = vpack.c.bf16 %v4164_v3, %v4164_v3  ;;  %v4162_v47 = vmax.f32 %v4126_v15, 0.0  ;;  %v3981_v28 = vadd.f32 %v5519_v18, %v3640_v42  ;;  %v4131_v29 = vadd.f32 %v4883_v22, %v4023_v35 }
 0x1f3   : > { %v4021_v20 = vadd.f32 %v7076_v34, %v3978_v59  ;;  %v5479_v48 = vpop.f32.mrf.mxu1  ;;  %v3862_v38 = vpop.f32.mrf.mxu0  ;;  %v3641_v60 = vadd.f32 %v3534_v43, %v6998_v44  ;;  %v4887_v59 = vunpack.c.l.bf16 %v4938_v52 }
 0x1f4   : > { %4345 = vst.msk [vmem:[%s7095_s13 + $0x1c] sm:$0xf] %vm4337_vm7, %v4832_v0  ;;  %v4830_v54 = vpack.c.bf16 %v4162_v47, %v4162_v47  ;;  %v4024_v8 = vadd.f32 %v7076_v34, %v3981_v28  ;;  %v3979_v21 = vadd.f32 %v3862_v38, %v3638_v40  ;;  %v4167_v36 = vmax.f32 %v4131_v29, 0.0  ;;  %v7143_v0 = vld [vmem:[%s7065_s8 + $0x48] sm:$0xff]  }
 0x1f5   : > { %v4129_v7 = vadd.f32 %v4879_v62, %v4021_v20  ;;  %v3537_v1 = vpop.f32.mrf.mxu1  ;;  %v5522_v13 = vpop.f32.mrf.mxu0  ;;  %v3644_v3 = vadd.f32 %v5479_v48, %v7001_v14  ;;  %v4892_v28 = vunpack.c.h.bf16 %v4939_v26  ;;  %v4888_v20 = vunpack.c.h.bf16 %v4938_v52 }
 0x1f6   : > { %4343 = vst.msk [vmem:[%s7095_s13 + $0x14] sm:$0xf] %vm4337_vm7, %v4830_v54  ;;  %v4132_v46 = vadd.f32 %v4884_v30, %v4024_v8  ;;  %v4022_v61 = vadd.f32 %v7076_v34, %v3979_v21  ;;  %v3984_v41 = vadd.f32 %v5522_v13, %v3643_v2  ;;  %v4835_v58 = vpack.c.bf16 %v4167_v36, %v4167_v36 }
 0x1f7   : > { %v4165_v9 = vmax.f32 %v4129_v7, 0.0  ;;  %v5482_v27 = vpop.f32.mrf.mxu1  ;;  %v3875_v50 = vpop.f32.mrf.mxu0  ;;  %v3642_v43 = vadd.f32 %v3537_v1, %v7004_v49  ;;  %v4899_v36 = vunpack.c.l.bf16 %v7143_v0  ;;  %v4940_v7 = vld [vmem:[%s7065_s8 + $0x40] sm:$0xff]  }
 0x1f8   : > { %v4168_v22 = vmax.f32 %v4132_v46, 0.0  ;;  %v4130_v23 = vadd.f32 %v4880_v63, %v4022_v61  ;;  %v4027_v45 = vadd.f32 %v7076_v34, %v3984_v41  ;;  %4348 = vst.msk [vmem:[%s7095_s13 + $0x28] sm:$0xf] %vm4337_vm7, %v4835_v58  ;;  %v3982_v35 = vadd.f32 %v3875_v50, %v3641_v60 }
 0x1f9   : > { %v4833_v42 = vpack.c.bf16 %v4165_v9, %v4165_v9  ;;  %v3550_v15 = vpop.f32.mrf.mxu1  ;;  %v5523_v62 = vpop.f32.mrf.mxu0  ;;  %v3647_v49 = vadd.f32 %v5482_v27, %v7007_v11  ;;  %v4895_v9 = vunpack.c.l.bf16 %v4940_v7 }
 0x1fa   : > { %v4836_v44 = vpack.c.bf16 %v4168_v22, %v4168_v22  ;;  %v4166_v18 = vmax.f32 %v4130_v23, 0.0  ;;  %v4135_v30 = vadd.f32 %v4891_v12, %v4027_v45  ;;  %v4025_v40 = vadd.f32 %v7076_v34, %v3982_v35 }
 0x1fb   : > { %4346 = vst.msk [vmem:[%s7095_s13 + $0x20] sm:$0xf] %vm4337_vm7, %v4833_v42  ;;  %v5483_v47 = vpop.f32.mrf.mxu1  ;;  %v3985_v14 = vadd.f32 %v5523_v62, %v3644_v3  ;;  %v3878_v29 = vpop.f32.mrf.mxu0  ;;  %v3645_v1 = vadd.f32 %v3550_v15, %v7010_v24  ;;  %v7164_v15 = vld [vmem:[%s7065_s8 + $0x58] sm:$0xff]  }
 0x1fc   : > { %4349 = vst.msk [vmem:[%s7095_s13 + $0x2c] sm:$0xf] %vm4337_vm7, %v4836_v44  ;;  %v4834_v48 = vpack.c.bf16 %v4166_v18, %v4166_v18  ;;  %v4171_v38 = vmax.f32 %v4135_v30, 0.0  ;;  %v3983_v63 = vadd.f32 %v3878_v29, %v3642_v43  ;;  %v4133_v54 = vadd.f32 %v4887_v59, %v4025_v40 }
 0x1fd   : > { %v4028_v2 = vadd.f32 %v7076_v34, %v3985_v14  ;;  %v3553_v8 = vpop.f32.mrf.mxu1  ;;  %v5526_v21 = vpop.f32.mrf.mxu0  ;;  %v3648_v50 = vadd.f32 %v5483_v47, %v7013_v51  ;;  %v4900_v51 = vunpack.c.h.bf16 %v7143_v0  ;;  %v7172_v14 = vld [vmem:[%s7065_s8 + $0x50] sm:$0xff]  }
 0x1fe   : > { %4347 = vst.msk [vmem:[%s7095_s13 + $0x24] sm:$0xf] %vm4337_vm7, %v4834_v48  ;;  %v4839_v26 = vpack.c.bf16 %v4171_v38, %v4171_v38  ;;  %v4026_v13 = vadd.f32 %v7076_v34, %v3983_v63  ;;  %v3988_v46 = vadd.f32 %v5526_v21, %v3647_v49  ;;  %v4169_v11 = vmax.f32 %v4133_v54, 0.0 }
 0x1ff   : > { %v4136_v61 = vadd.f32 %v4892_v28, %v4028_v2  ;;  %v5486_v41 = vpop.f32.mrf.mxu1  ;;  %v3891_v12 = vpop.f32.mrf.mxu0  ;;  %v3646_v59 = vadd.f32 %v3553_v8, %v7016_v55  ;;  %v4907_v49 = vunpack.c.l.bf16 %v7164_v15 }
 0x200   : > { %4352 = vst.msk [vmem:[%s7095_s13 + $0x38] sm:$0xf] %vm4337_vm7, %v4839_v26  ;;  %v4134_v52 = vadd.f32 %v4888_v20, %v4026_v13  ;;  %v4031_v58 = vadd.f32 %v7076_v34, %v3988_v46  ;;  %v3986_v60 = vadd.f32 %v3891_v12, %v3645_v1  ;;  %v4837_v27 = vpack.c.bf16 %v4169_v11, %v4169_v11 }
 0x201   : > { %v4172_v24 = vmax.f32 %v4136_v61, 0.0  ;;  %v3566_v22 = vpop.f32.mrf.mxu1  ;;  %v5527_v23 = vpop.f32.mrf.mxu0  ;;  %v3651_v30 = vadd.f32 %v5486_v41, %v7019_v19  ;;  %v4896_v20 = vunpack.c.h.bf16 %v4940_v7 }
 0x202   : > { %v4170_v45 = vmax.f32 %v4134_v52, 0.0  ;;  %v4139_v42 = vadd.f32 %v4899_v36, %v4031_v58  ;;  %v4029_v3 = vadd.f32 %v7076_v34, %v3986_v60  ;;  %4350 = vst.msk [vmem:[%s7095_s13 + $0x30] sm:$0xf] %vm4337_vm7, %v4837_v27  ;;  %v3989_v44 = vadd.f32 %v5527_v23, %v3648_v50 }
 0x203   : > { %v4840_v35 = vpack.c.bf16 %v4172_v24, %v4172_v24  ;;  %v5487_v62 = vpop.f32.mrf.mxu1  ;;  %v3894_v43 = vpop.f32.mrf.mxu0  ;;  %v3649_v19 = vadd.f32 %v3566_v22, %v7022_v32  ;;  %v4903_v36 = vunpack.c.l.bf16 %v7172_v14  ;;  %v4908_v58 = vunpack.c.h.bf16 %v7164_v15 }
 0x204   : > { %v4838_v18 = vpack.c.bf16 %v4170_v45, %v4170_v45  ;;  %v4175_v40 = vmax.f32 %v4139_v42, 0.0  ;;  %v4137_v47 = vadd.f32 %v4895_v9, %v4029_v3  ;;  %v4032_v28 = vadd.f32 %v7076_v34, %v3989_v44  ;;  %v4945_v45 = vld [vmem:[%s7065_s8 + $0x68] sm:$0xff]   ;;  %v7195_v42 = vld [vmem:[%s7065_s8 + $0x60] sm:$0xff]  }
 0x205   : > { %4353 = vst.msk [vmem:[%s7095_s13 + $0x3c] sm:$0xf] %vm4337_vm7, %v4840_v35  ;;  %v3569_v29 = vpop.f32.mrf.mxu1  ;;  %v3987_v55 = vadd.f32 %v3894_v43, %v3646_v59  ;;  %v5530_v48 = vpop.f32.mrf.mxu0  ;;  %v3652_v26 = vadd.f32 %v5487_v62, %v7025_v10 }
 0x206   : > { %4351 = vst.msk [vmem:[%s7095_s13 + $0x34] sm:$0xf] %vm4337_vm7, %v4838_v18  ;;  %v4843_v0 = vpack.c.bf16 %v4175_v40, %v4175_v40  ;;  %v4173_v38 = vmax.f32 %v4137_v47, 0.0  ;;  %v3992_v63 = vadd.f32 %v5530_v48, %v3651_v30  ;;  %v4140_v54 = vadd.f32 %v4900_v51, %v4032_v28 }
 0x207   : > { %v4030_v2 = vadd.f32 %v7076_v34, %v3987_v55  ;;  %v5490_v8 = vpop.f32.mrf.mxu1  ;;  %v3907_v21 = vpop.f32.mrf.mxu0  ;;  %v3650_v10 = vadd.f32 %v3569_v29, %v7028_v53  ;;  %v4904_v53 = vunpack.c.h.bf16 %v7172_v14  ;;  %v4915_v28 = vunpack.c.l.bf16 %v4945_v45 }
 0x208   : > { %4356 = vst.msk [vmem:[%s7095_s13 + $0x48] sm:$0xf] %vm4337_vm7, %v4843_v0  ;;  %v4841_v7 = vpack.c.bf16 %v4173_v38, %v4173_v38  ;;  %v4035_v1 = vadd.f32 %v7076_v34, %v3992_v63  ;;  %v3990_v13 = vadd.f32 %v3907_v21, %v3649_v19  ;;  %v4176_v46 = vmax.f32 %v4140_v54, 0.0 }
 0x209   : > { %v4138_v32 = vadd.f32 %v4896_v20, %v4030_v2  ;;  %v3582_v11 = vpop.f32.mrf.mxu1  ;;  %v5531_v61 = vpop.f32.mrf.mxu0  ;;  %v3655_v35 = vadd.f32 %v5490_v8, %v7031_v16  ;;  %v4911_v29 = vunpack.c.l.bf16 %v7195_v42  ;;  %v4916_v38 = vunpack.c.h.bf16 %v4945_v45 }
 0x20a   : > { %4354 = vst.msk [vmem:[%s7095_s13 + $0x40] sm:$0xf] %vm4337_vm7, %v4841_v7  ;;  %v4143_v41 = vadd.f32 %v4907_v49, %v4035_v1  ;;  %v4033_v12 = vadd.f32 %v7076_v34, %v3990_v13  ;;  %v3993_v52 = vadd.f32 %v5531_v61, %v3652_v26  ;;  %v4844_v60 = vpack.c.bf16 %v4176_v46, %v4176_v46 }
 0x20b   : > { %v4174_v9 = vmax.f32 %v4138_v32, 0.0  ;;  %v5491_v27 = vpop.f32.mrf.mxu1  ;;  %v3910_v50 = vpop.f32.mrf.mxu0  ;;  %v3653_v51 = vadd.f32 %v3582_v11, %v7034_v25  ;;  %v4912_v46 = vunpack.c.h.bf16 %v7195_v42  ;;  %v4947_v32 = vld [vmem:[%s7065_s8 + $0x78] sm:$0xff]  }
 0x20c   : > { %v4179_v24 = vmax.f32 %v4143_v41, 0.0  ;;  %v4141_v22 = vadd.f32 %v4903_v36, %v4033_v12  ;;  %v4036_v23 = vadd.f32 %v7076_v34, %v3993_v52  ;;  %4357 = vst.msk [vmem:[%s7095_s13 + $0x4c] sm:$0xf] %vm4337_vm7, %v4844_v60  ;;  %v3991_v59 = vadd.f32 %v3910_v50, %v3650_v10  ;;  %v4946_v10 = vld [vmem:[%s7065_s8 + $0x70] sm:$0xff]  }
 0x20d   : > { %v4842_v3 = vpack.c.bf16 %v4174_v9, %v4174_v9  ;;  %v3585_v15 = vpop.f32.mrf.mxu1  ;;  %v5534_v62 = vpop.f32.mrf.mxu0  ;;  %v3656_v55 = vadd.f32 %v5491_v27, %v7037_v37 }
 0x20e   : > { %v4847_v44 = vpack.c.bf16 %v4179_v24, %v4179_v24  ;;  %v4177_v43 = vmax.f32 %v4141_v22, 0.0  ;;  %v4144_v18 = vadd.f32 %v4908_v58, %v4036_v23  ;;  %v4034_v30 = vadd.f32 %v7076_v34, %v3991_v59 }
 0x20f   : > { %4355 = vst.msk [vmem:[%s7095_s13 + $0x44] sm:$0xf] %vm4337_vm7, %v4842_v3  ;;  %v5494_v40 = vpop.f32.mrf.mxu1  ;;  %v3996_v47 = vadd.f32 %v5534_v62, %v3655_v35  ;;  %v3923_v16 = vpop.f32.mrf.mxu0  ;;  %v3654_v54 = vadd.f32 %v3585_v15, %v7040_v56  ;;  %v4923_v22 = vunpack.c.l.bf16 %v4947_v32  ;;  %v4924_v62 = vunpack.c.h.bf16 %v4947_v32 }
 0x210   : > { %4360 = vst.msk [vmem:[%s7095_s13 + $0x58] sm:$0xf] %vm4337_vm7, %v4847_v44  ;;  %v4845_v14 = vpack.c.bf16 %v4177_v43, %v4177_v43  ;;  %v4180_v20 = vmax.f32 %v4144_v18, 0.0  ;;  %v3994_v25 = vadd.f32 %v3923_v16, %v3653_v51  ;;  %v4142_v48 = vadd.f32 %v4904_v53, %v4034_v30  ;;  %v4949_v18 = vld [vmem:[%s7065_s8 + $0x88] sm:$0xff]  }
 0x211   : > { %v4039_v49 = vadd.f32 %v7076_v34, %v3996_v47  ;;  %v3598_v0 = vpop.f32.mrf.mxu1  ;;  %v5535_v19 = vpop.f32.mrf.mxu0  ;;  %v3659_v56 = vadd.f32 %v5494_v40, %v7043_v57  ;;  %v4919_v53 = vunpack.c.l.bf16 %v4946_v10  ;;  %v4920_v16 = vunpack.c.h.bf16 %v4946_v10 }
 0x212   : > { %4358 = vst.msk [vmem:[%s7095_s13 + $0x50] sm:$0xf] %vm4337_vm7, %v4845_v14  ;;  %v4848_v63 = vpack.c.bf16 %v4180_v20, %v4180_v20  ;;  %v4037_v2 = vadd.f32 %v7076_v34, %v3994_v25  ;;  %v3997_v8 = vadd.f32 %v5535_v19, %v3656_v55  ;;  %v4178_v21 = vmax.f32 %v4142_v48, 0.0  ;;  %v4948_v25 = vld [vmem:[%s7065_s8 + $0x80] sm:$0xff]  }
 0x213   : > { %v4147_v37 = vadd.f32 %v4915_v28, %v4039_v49  ;;  %v5495_v36 = vpop.f32.mrf.mxu1  ;;  %v3926_v7 = vpop.f32.mrf.mxu0  ;;  %v3657_v27 = vadd.f32 %v3598_v0, %v7046_v31  ;;  %v4931_v0 = vunpack.c.l.bf16 %v4949_v18 }
 0x214   : > { %4361 = vst.msk [vmem:[%s7095_s13 + $0x5c] sm:$0xf] %vm4337_vm7, %v4848_v63  ;;  %v4145_v26 = vadd.f32 %v4911_v29, %v4037_v2  ;;  %v4040_v1 = vadd.f32 %v7076_v34, %v3997_v8  ;;  %v3995_v13 = vadd.f32 %v3926_v7, %v3654_v54  ;;  %v4846_v11 = vpack.c.bf16 %v4178_v21, %v4178_v21 }
 0x215   : > { %v4183_v61 = vmax.f32 %v4147_v37, 0.0  ;;  %v3601_v41 = vpop.f32.mrf.mxu1  ;;  %v5538_v12 = vpop.f32.mrf.mxu0  ;;  %v3660_v45 = vadd.f32 %v5495_v36, %v7049_v4  ;;  %v4927_v37 = vunpack.c.l.bf16 %v4948_v25 }
 0x216   : > { %v4181_v52 = vmax.f32 %v4145_v26, 0.0  ;;  %v4148_v58 = vadd.f32 %v4916_v38, %v4040_v1  ;;  %v4038_v60 = vadd.f32 %v7076_v34, %v3995_v13  ;;  %4359 = vst.msk [vmem:[%s7095_s13 + $0x54] sm:$0xf] %vm4337_vm7, %v4846_v11  ;;  %v4000_v24 = vadd.f32 %v5538_v12, %v3659_v56 }
 0x217   : > { %v4851_v9 = vpack.c.bf16 %v4183_v61, %v4183_v61  ;;  %v5498_v50 = vpop.f32.mrf.mxu1  ;;  %v3939_v23 = vpop.f32.mrf.mxu0  ;;  %v3658_v51 = vadd.f32 %v3601_v41, %v7052_v6 }
 0x218   : > { %v4849_v57 = vpack.c.bf16 %v4181_v52, %v4181_v52  ;;  %v4184_v42 = vmax.f32 %v4148_v58, 0.0  ;;  %v4146_v3 = vadd.f32 %v4912_v46, %v4038_v60  ;;  %v4043_v35 = vadd.f32 %v7076_v34, %v4000_v24 }
 0x219   : > { %4364 = vst.msk [vmem:[%s7095_s13 + $0x68] sm:$0xf] %vm4337_vm7, %v4851_v9  ;;  %v3614_v15 = vpop.f32.mrf.mxu1  ;;  %v3998_v59 = vadd.f32 %v3939_v23, %v3657_v27  ;;  %v5539_v31 = vpop.f32.mrf.mxu0  ;;  %v3663_v14 = vadd.f32 %v5498_v50, %v7056_v5  ;;  %v4932_v52 = vunpack.c.h.bf16 %v4949_v18  ;;  %v4928_v60 = vunpack.c.h.bf16 %v4948_v25 }
 0x21a   : > { %4362 = vst.msk [vmem:[%s7095_s13 + $0x60] sm:$0xf] %vm4337_vm7, %v4849_v57  ;;  %v4852_v44 = vpack.c.bf16 %v4184_v42, %v4184_v42  ;;  %v4182_v43 = vmax.f32 %v4146_v3, 0.0  ;;  %v4001_v4 = vadd.f32 %v5539_v31, %v3660_v45  ;;  %v4151_v30 = vadd.f32 %v4923_v22, %v4043_v35 }
 0x21b   : > { %v4041_v40 = vadd.f32 %v7076_v34, %v3998_v59  ;;  %v5499_v47 = vpop.f32.mrf.mxu1  ;;  %v3942_v28 = vpop.f32.mrf.mxu0  ;;  %v3661_v19 = vadd.f32 %v3614_v15, %v7058_v17 }
 0x21c   : > { %4365 = vst.msk [vmem:[%s7095_s13 + $0x6c] sm:$0xf] %vm4337_vm7, %v4852_v44  ;;  %v4850_v29 = vpack.c.bf16 %v4182_v43, %v4182_v43  ;;  %v4044_v55 = vadd.f32 %v7076_v34, %v4001_v4  ;;  %v3999_v20 = vadd.f32 %v3942_v28, %v3658_v51  ;;  %v4187_v6 = vmax.f32 %v4151_v30, 0.0 }
 0x21d   : > { %v4149_v48 = vadd.f32 %v4919_v53, %v4041_v40  ;;  %v5542_v49 = vpop.f32.mrf.mxu0  ;;  %v3617_v63 = vpop.f32.mrf.mxu1  ;;  %v3664_v17 = vadd.f32 %v5499_v47, %v7067_v39 }
 0x21e   : > { %4363 = vst.msk [vmem:[%s7095_s13 + $0x64] sm:$0xf] %vm4337_vm7, %v4850_v29  ;;  %v4152_v38 = vadd.f32 %v4924_v62, %v4044_v55  ;;  %v4042_v54 = vadd.f32 %v7076_v34, %v3999_v20  ;;  %v4004_v2 = vadd.f32 %v5542_v49, %v3663_v14  ;;  %v4855_v8 = vpack.c.bf16 %v4187_v6, %v4187_v6 }
 0x21f   : > { %v4185_v5 = vmax.f32 %v4149_v48, 0.0  ;;  %v3955_v21 = vpop.f32.mrf.mxu0  ;;  %v3662_v46 = vadd.f32 %v3617_v63, %v7071_v33 }
 0x220   : > { %v4188_v36 = vmax.f32 %v4152_v38, 0.0  ;;  %v4150_v7 = vadd.f32 %v4920_v16, %v4042_v54  ;;  %v4047_v26 = vadd.f32 %v7076_v34, %v4004_v2  ;;  %v4002_v1 = vadd.f32 %v3955_v21, %v3661_v19  ;;  %4368 = vst.msk [vmem:[%s7095_s13 + $0x78] sm:$0xf] %vm4337_vm7, %v4855_v8 }
 0x221   : > { %v4853_v13 = vpack.c.bf16 %v4185_v5, %v4185_v5  ;;  %v5543_v32 = vpop.f32.mrf.mxu0 }
 0x222   : > { %v4856_v11 = vpack.c.bf16 %v4188_v36, %v4188_v36  ;;  %v4186_v56 = vmax.f32 %v4150_v7, 0.0  ;;  %v4155_v61 = vadd.f32 %v4931_v0, %v4047_v26  ;;  %v4045_v41 = vadd.f32 %v7076_v34, %v4002_v1 }
 0x223   : > { %4366 = vst.msk [vmem:[%s7095_s13 + $0x70] sm:$0xf] %vm4337_vm7, %v4853_v13  ;;  %v4005_v12 = vadd.f32 %v5543_v32, %v3664_v17  ;;  %v3958_v58 = vpop.f32.mrf.mxu0 }
 0x224   : > { %4369 = vst.msk [vmem:[%s7095_s13 + $0x7c] sm:$0xf] %vm4337_vm7, %v4856_v11  ;;  %v4854_v39 = vpack.c.bf16 %v4186_v56, %v4186_v56  ;;  %v4191_v10 = vmax.f32 %v4155_v61, 0.0  ;;  %v4153_v33 = vadd.f32 %v4927_v37, %v4045_v41  ;;  %v4003_v9 = vadd.f32 %v3958_v58, %v3662_v46 }
 0x225   : > { %v4048_v27 = vadd.f32 %v7076_v34, %v4005_v12 }
 0x226   : > { %4367 = vst.msk [vmem:[%s7095_s13 + $0x74] sm:$0xf] %vm4337_vm7, %v4854_v39  ;;  %v4859_v50 = vpack.c.bf16 %v4191_v10, %v4191_v10  ;;  %v4189_v24 = vmax.f32 %v4153_v33, 0.0  ;;  %v4046_v22 = vadd.f32 %v7076_v34, %v4003_v9 }
 0x227   : > { %v4156_v23 = vadd.f32 %v4932_v52, %v4048_v27 }
 0x228   : > { %4372 = vst.msk [vmem:[%s7095_s13 + $0x88] sm:$0xf] %vm4337_vm7, %v4859_v50  ;;  %v4857_v57 = vpack.c.bf16 %v4189_v24, %v4189_v24  ;;  %v4154_v45 = vadd.f32 %v4928_v60, %v4046_v22 }
 0x229   : > { %v4192_v42 = vmax.f32 %v4156_v23, 0.0 }
 0x22a   : > { %4370 = vst.msk [vmem:[%s7095_s13 + $0x80] sm:$0xf] %vm4337_vm7, %v4857_v57  ;;  %v4190_v3 = vmax.f32 %v4154_v45, 0.0 }
 0x22b   : > { %v4860_v35 = vpack.c.bf16 %v4192_v42, %v4192_v42 }
 0x22c   : > { %v4858_v15 = vpack.c.bf16 %v4190_v3, %v4190_v3 }
 0x22d   : > { %4373 = vst.msk [vmem:[%s7095_s13 + $0x8c] sm:$0xf] %vm4337_vm7, %v4860_v35 }
 0x22e   : > { %4371 = vst.msk [vmem:[%s7095_s13 + $0x84] sm:$0xf] %vm4337_vm7, %v4858_v15 }
 0x22f PF: > { %s14_s17 = sadd.s32 1, %s5698_s17   ;;  %s7321_s15 = smov %s5694_s16 }
 0x230   : > { %p11_p5 = scmp.ge.s32.totalorder %s14_s17, 4   ;;  %s7322_s16 = smov %s7324_s18 }
 0x232   :  { %13 = sbr.rel (!%p11_p5) target bundleno = 2 (0x2), region = 75 }

</bundles_post_ra>
